<compile_context>
chip_gen: v7x
topology: tpu7x:2x2x1
jax: 0.10.0
libtpu: 0.0.40
codegen_flags: <defaults>
</compile_context>

<pallas_src>
import jax
import jax.numpy as jnp
from jax.experimental import pallas as pl
from jax.experimental.pallas import tpu as pltpu


# ----------------------------- helpers --------------------------------------

def _ceil_to(x, m):
    return ((x + m - 1) // m) * m


# ----------------------------- Pallas kernels -------------------------------

def _make_gemm_kernel(has_scale: bool, relu: bool):
    """K-accumulating GEMM (grid axis 1 = K tiles) into an f32 VMEM scratch,
    with a fused affine (+ReLU) epilogue and a single store at the last K step."""

    def body(x_ref, w_ref, scale_ref, bias_ref, o_ref, acc_ref):
        k = pl.program_id(1)

        @pl.when(k == 0)
        def _():
            acc_ref[...] = jnp.zeros_like(acc_ref)

        acc_ref[...] += jnp.dot(x_ref[...], w_ref[...],
                                preferred_element_type=jnp.float32)

        @pl.when(k == pl.num_programs(1) - 1)
        def _():
            y = acc_ref[...]
            if has_scale:
                y = y * scale_ref[...]
            y = y + bias_ref[...]
            if relu:
                y = jnp.maximum(y, 0.0)
            o_ref[...] = y.astype(o_ref.dtype)

    if has_scale:
        def kernel(x_ref, w_ref, scale_ref, bias_ref, o_ref, acc_ref):
            body(x_ref, w_ref, scale_ref, bias_ref, o_ref, acc_ref)
    else:
        def kernel(x_ref, w_ref, bias_ref, o_ref, acc_ref):
            body(x_ref, w_ref, None, bias_ref, o_ref, acc_ref)
    return kernel


# --------------------------- Pallas call wrapper -----------------------------

def fused_matmul(x, w, bias, *, scale=None, relu=False,
                 out_dtype=jnp.bfloat16, tile_s=512, max_tile_k=2048):
    """out[s, co] = act((x @ w)[s, co] * scale[co] + bias[co]).

    x: (NS, K), w: (K, Cout).  Inputs may be bf16 or f32; accumulation is always
    f32 in a VMEM scratch; the epilogue runs in f32 and stores once in out_dtype.
    Cout is lane-padded to a multiple of 128 (padding sliced off before return).
    """
    NS, K = x.shape
    Cout = w.shape[1]

    # Lane-dense output: pad Cout up to a multiple of 128.
    cout_p = max(128, _ceil_to(Cout, 128))
    if cout_p != Cout:
        w = jnp.pad(w, ((0, 0), (0, cout_p - Cout)))
        bias = jnp.pad(bias, (0, cout_p - Cout))
        if scale is not None:
            scale = jnp.pad(scale, (0, cout_p - Cout))

    # K tiling: a single K step when the 128-aligned depth fits max_tile_k,
    # otherwise near-equal 128-aligned chunks (zero padding in K is harmless).
    k128 = max(128, _ceil_to(K, 128))
    if k128 <= max_tile_k:
        tk = k128
    else:
        nsteps = -(-k128 // max_tile_k)
        tk = _ceil_to(-(-K // nsteps), 128)
    k_p = _ceil_to(K, tk)
    if k_p != K:
        x = jnp.pad(x, ((0, 0), (0, k_p - K)))
        w = jnp.pad(w, ((0, k_p - K), (0, 0)))

    # Spatial tiling (sublane multiple of 8); pad rows if NS is not divisible.
    ts = min(tile_s, _ceil_to(NS, 8))
    ns_p = _ceil_to(NS, ts)
    if ns_p != NS:
        x = jnp.pad(x, ((0, ns_p - NS), (0, 0)))

    grid = (ns_p // ts, k_p // tk)

    in_specs = [
        pl.BlockSpec((ts, tk), lambda s, k: (s, k)),
        pl.BlockSpec((tk, cout_p), lambda s, k: (k, 0)),
    ]
    args = [x, w]
    if scale is not None:
        in_specs.append(pl.BlockSpec((1, cout_p), lambda s, k: (0, 0)))
        args.append(scale.reshape(1, cout_p).astype(jnp.float32))
    in_specs.append(pl.BlockSpec((1, cout_p), lambda s, k: (0, 0)))
    args.append(bias.reshape(1, cout_p).astype(jnp.float32))

    out = pl.pallas_call(
        _make_gemm_kernel(scale is not None, relu),
        out_shape=jax.ShapeDtypeStruct((ns_p, cout_p), out_dtype),
        grid_spec=pltpu.PrefetchScalarGridSpec(
            num_scalar_prefetch=0,
            grid=grid,
            in_specs=in_specs,
            out_specs=pl.BlockSpec((ts, cout_p), lambda s, k: (s, 0)),
            scratch_shapes=[pltpu.VMEM((ts, cout_p), jnp.float32)],
        ),
        compiler_params=pltpu.CompilerParams(
            dimension_semantics=("parallel", "arbitrary"),
            vmem_limit_bytes=32 * 1024 * 1024),
    )(*args)
    return out[:NS, :Cout]


# ------------------------------ conv layers ----------------------------------

def conv3d_im2col(x, w_taps, bias, *, scale=None, relu,
                  compute_dtype=jnp.bfloat16, out_dtype=jnp.bfloat16):
    """3x3x3 conv, stride 1, pad 1, with fused affine (+ReLU) epilogue.

    Taps are folded into the contraction dim: x -> (NS, 27*Cin), w -> (27*Cin, Cout).
    """
    N, D, H, W, Cin = x.shape
    KT, _, Cout = w_taps.shape                 # (27, Cin, Cout)
    xc = x.astype(compute_dtype)
    xp = jnp.pad(xc, ((0, 0), (1, 1), (1, 1), (1, 1), (0, 0)))
    cols = []
    for kd in range(3):
        for kh in range(3):
            for kw in range(3):
                cols.append(xp[:, kd:kd + D, kh:kh + H, kw:kw + W, :]
                            .reshape(N * D * H * W, Cin))
    x2 = jnp.concatenate(cols, axis=-1)        # (NS, 27*Cin), tap-major / cin-minor
    w2 = w_taps.reshape(KT * Cin, Cout).astype(compute_dtype)
    y = fused_matmul(x2, w2, bias, scale=scale, relu=relu, out_dtype=out_dtype)
    return y.reshape(N, D, H, W, Cout)


def fold_bn(conv_b, gamma, beta, mean, var, eps=1e-5):
    scale = gamma / jnp.sqrt(var + eps)
    bias = beta + (conv_b - mean) * scale
    return scale, bias


def conv_block(x, p):
    """Conv3d(3,3,3, pad=1) + BatchNorm3d (folded, eval stats) + ReLU, bf16."""
    scale, bias = fold_bn(p['b'], p['gamma'], p['beta'], p['mean'], p['var'])
    return conv3d_im2col(x, p['w'], bias, scale=scale, relu=True,
                         compute_dtype=jnp.bfloat16, out_dtype=jnp.bfloat16)


def conv_transpose3d_2x2s2(x, p):
    """ConvTranspose3d(k=2, stride=2): per-voxel GEMM to 8*Cout, then scatter."""
    w, b = p['w'], p['b']                       # w: (Cin, Cout, 2, 2, 2)
    N, D, H, W, Cin = x.shape
    Cout = w.shape[1]
    wr = jnp.transpose(w, (0, 2, 3, 4, 1)).reshape(Cin, 8 * Cout).astype(jnp.bfloat16)
    x2 = x.reshape(N * D * H * W, Cin).astype(jnp.bfloat16)
    bias = jnp.tile(b, 8)                       # bias per cout, repeated per tap
    y = fused_matmul(x2, wr, bias, scale=None, relu=False, out_dtype=jnp.bfloat16)
    y = y.reshape(N, D, H, W, 2, 2, 2, Cout)
    y = jnp.transpose(y, (0, 1, 4, 2, 5, 3, 6, 7)).reshape(
        N, 2 * D, 2 * H, 2 * W, Cout)
    return y


def conv_transpose3d_3x3s1p1_final(x, p):
    """ConvTranspose3d(k=3, stride=1, pad=1) == conv3d(pad=1) with flipped kernel.
    Runs fully in float32, matching the reference's autocast(enabled=False) block."""
    w, b = p['w'], p['b']                       # w: (Cin, Cout, 3, 3, 3)
    Cin, Cout = w.shape[0], w.shape[1]
    w_flip = w[:, :, ::-1, ::-1, ::-1]
    w_taps = jnp.transpose(w_flip, (2, 3, 4, 0, 1)).reshape(27, Cin, Cout)
    return conv3d_im2col(x.astype(jnp.float32), w_taps, b, scale=None, relu=False,
                         compute_dtype=jnp.float32, out_dtype=jnp.float32)


def max_pool3d_2x2x2(x):
    """MaxPool3d(2) — memory-bound reduction left to XLA (see perf review)."""
    N, D, H, W, C = x.shape
    return x.reshape(N, D // 2, 2, H // 2, 2, W // 2, 2, C).max(axis=(2, 4, 6))


# ------------------------------ parameters ----------------------------------

def init_conv_bn(key, cin, cout, k=3):
    k1, k2 = jax.random.split(key)
    fan_in = cin * k ** 3
    w = jax.random.normal(k1, (k ** 3, cin, cout), jnp.float32) / jnp.sqrt(fan_in)
    b = jax.random.normal(k2, (cout,), jnp.float32) * 0.01
    return dict(w=w, b=b,
                gamma=jnp.ones((cout,), jnp.float32),
                beta=jnp.zeros((cout,), jnp.float32),
                mean=jnp.zeros((cout,), jnp.float32),
                var=jnp.ones((cout,), jnp.float32))


def init_convT(key, cin, cout, k):
    k1, k2 = jax.random.split(key)
    fan_in = cin * k ** 3
    w = jax.random.normal(k1, (cin, cout, k, k, k), jnp.float32) / jnp.sqrt(fan_in)
    b = jax.random.normal(k2, (cout,), jnp.float32) * 0.01
    return dict(w=w, b=b)


def init_params(key, n_classes):
    keys = jax.random.split(key, 20)
    p = {}
    # encoder
    p['ec0'] = init_conv_bn(keys[0], 1, 32)
    p['ec1'] = init_conv_bn(keys[1], 32, 64)
    p['ec2'] = init_conv_bn(keys[2], 64, 64)
    p['ec3'] = init_conv_bn(keys[3], 64, 128)
    p['ec4'] = init_conv_bn(keys[4], 128, 128)
    p['ec5'] = init_conv_bn(keys[5], 128, 256)
    p['ec6'] = init_conv_bn(keys[6], 256, 256)
    p['ec7'] = init_conv_bn(keys[7], 256, 512)
    # decoder
    p['dc9'] = init_convT(keys[8], 512, 512, 2)
    p['dc8'] = init_conv_bn(keys[9], 256 + 512, 256)
    p['dc7'] = init_conv_bn(keys[10], 256, 256)
    p['dc6'] = init_convT(keys[11], 256, 256, 2)
    p['dc5'] = init_conv_bn(keys[12], 128 + 256, 128)
    p['dc4'] = init_conv_bn(keys[13], 128, 128)
    p['dc3'] = init_convT(keys[14], 128, 128, 2)
    p['dc2'] = init_conv_bn(keys[15], 64 + 128, 64)
    p['dc1'] = init_conv_bn(keys[16], 64, 64)
    p['final'] = init_convT(keys[17], 64, n_classes, 3)
    return p


# ------------------------------ forward pass ---------------------------------

def pad_unet3d_multi_forward(params, x):
    if x.ndim == 4:                      # torch: unsqueeze(dim=1) -> add C axis
        x = x[..., None]
    # ---- encoder (bf16 compute, f32 accumulate — mirrors fp16 autocast) ----
    h = conv_block(x, params['ec0'])
    feat_0 = conv_block(h, params['ec1'])
    h = max_pool3d_2x2x2(feat_0)
    h = conv_block(h, params['ec2'])
    feat_1 = conv_block(h, params['ec3'])
    h = max_pool3d_2x2x2(feat_1)
    h = conv_block(h, params['ec4'])
    feat_2 = conv_block(h, params['ec5'])
    h = max_pool3d_2x2x2(feat_2)
    h = conv_block(h, params['ec6'])
    emb = conv_block(h, params['ec7'])
    # ---- decoder ----
    h = jnp.concatenate([conv_transpose3d_2x2s2(emb, params['dc9']), feat_2], axis=-1)
    h = conv_block(h, params['dc8'])
    h = conv_block(h, params['dc7'])
    h = jnp.concatenate([conv_transpose3d_2x2s2(h, params['dc6']), feat_1], axis=-1)
    h = conv_block(h, params['dc5'])
    h = conv_block(h, params['dc4'])
    h = jnp.concatenate([conv_transpose3d_2x2s2(h, params['dc3']), feat_0], axis=-1)
    h = conv_block(h, params['dc2'])
    h = conv_block(h, params['dc1'])
    return conv_transpose3d_3x3s1p1_final(h, params['final'])   # float32 final layer


# --------------------------------- main --------------------------------------

if __name__ == "__main__":
    n_classes = 3
    N, D, H, W = 2, 16, 16, 16

    key = jax.random.PRNGKey(0)
    kx, kp = jax.random.split(key)
    x = jax.random.normal(kx, (N, D, H, W), jnp.float32)   # 4-D -> unsqueeze path
    params = init_params(kp, n_classes)

    fwd = jax.jit(pad_unet3d_multi_forward)
    out = fwd(params, x)
    out = jax.block_until_ready(out)

    assert out.shape == (N, D, H, W, n_classes), out.shape
    assert out.dtype == jnp.float32
    assert bool(jnp.all(jnp.isfinite(out)))
    print("KERNEL_OK")
</pallas_src>

<mosaic_0001>
module attributes {stable_mosaic.version = 11 : i64} {
  func.func @kernel(%arg0: i32, %arg1: i32, %arg2: memref<512x128xbf16, #tpu.memory_space<vmem>>, %arg3: memref<128x128xbf16, #tpu.memory_space<vmem>>, %arg4: memref<1x128xf32, #tpu.memory_space<vmem>>, %arg5: memref<1x128xf32, #tpu.memory_space<vmem>>, %arg6: memref<512x128xbf16, #tpu.memory_space<vmem>>, %arg7: memref<512x128xf32, #tpu.memory_space<vmem>>) attributes {dimension_semantics = [#tpu.dimension_semantics<parallel>, #tpu.dimension_semantics<arbitrary>], iteration_bounds = array<i64: 16, 1>, scalar_prefetch = 0 : i64, scratch_operands = 1 : i64, tpu.core_type = #tpu.core_type<tc>, window_params = [{transform_indices = @transform_0, window_bounds = array<i64: 512, 128>}, {transform_indices = @transform_1, window_bounds = array<i64: 128, 128>}, {pipeline_mode = #tpu.pipeline_mode<synchronous>, transform_indices = @transform_2, window_bounds = array<i64: 1, 128>}, {pipeline_mode = #tpu.pipeline_mode<synchronous>, transform_indices = @transform_3, window_bounds = array<i64: 1, 128>}, {transform_indices = @transform_4, window_bounds = array<i64: 512, 128>}]} {
    %c0_i32 = arith.constant 0 : i32
    %0 = arith.cmpi eq, %arg1, %c0_i32 : i32
    %1 = arith.extui %0 : i1 to i32
    %c0_i32_0 = arith.constant 0 : i32
    %2 = arith.cmpi ne, %1, %c0_i32_0 : i32
    scf.if %2 {
      %cst_10 = arith.constant 0.000000e+00 : f32
      %12 = vector.broadcast %cst_10 : f32 to vector<512x128xf32>
      %c0_11 = arith.constant 0 : index
      %c0_12 = arith.constant 0 : index
      %13 = vector.load %arg7[%c0_11, %c0_12] : memref<512x128xf32, #tpu.memory_space<vmem>>, vector<512x128xf32>
      tpu.vector_store %arg7[%c0_11, %c0_12], %12 {strides = array<i32>} : memref<512x128xf32, #tpu.memory_space<vmem>>, vector<512x128xf32>,
    } else {
    }
    %c0 = arith.constant 0 : index
    %c0_1 = arith.constant 0 : index
    %3 = vector.load %arg7[%c0, %c0_1] : memref<512x128xf32, #tpu.memory_space<vmem>>, vector<512x128xf32>
    %c0_2 = arith.constant 0 : index
    %c0_3 = arith.constant 0 : index
    %4 = vector.load %arg2[%c0_2, %c0_3] : memref<512x128xbf16, #tpu.memory_space<vmem>>, vector<512x128xbf16>
    %c0_4 = arith.constant 0 : index
    %c0_5 = arith.constant 0 : index
    %5 = vector.load %arg3[%c0_4, %c0_5] : memref<128x128xbf16, #tpu.memory_space<vmem>>, vector<128x128xbf16>
    %cst = arith.constant dense<0.000000e+00> : vector<512x128xf32>
    %6 = tpu.matmul %4, %5, %cst {dimension_numbers = #tpu.dot_dimension_numbers<[1], [0], [0], [1], [0, 0, 1, 1], [], []>} : vector<512x128xbf16>, vector<128x128xbf16>, vector<512x128xf32> -> vector<512x128xf32>
    %7 = arith.addf %3, %6 : vector<512x128xf32>
    %c0_6 = arith.constant 0 : index
    %c0_7 = arith.constant 0 : index
    %8 = vector.load %arg7[%c0_6, %c0_7] : memref<512x128xf32, #tpu.memory_space<vmem>>, vector<512x128xf32>
    tpu.vector_store %arg7[%c0_6, %c0_7], %7 {strides = array<i32>} : memref<512x128xf32, #tpu.memory_space<vmem>>, vector<512x128xf32>,
    %c0_i32_8 = arith.constant 0 : i32
    %9 = arith.cmpi eq, %arg1, %c0_i32_8 : i32
    %10 = arith.extui %9 : i1 to i32
    %c0_i32_9 = arith.constant 0 : i32
    %11 = arith.cmpi ne, %10, %c0_i32_9 : i32
    scf.if %11 {
      %c0_10 = arith.constant 0 : index
      %c0_11 = arith.constant 0 : index
      %12 = vector.load %arg7[%c0_10, %c0_11] : memref<512x128xf32, #tpu.memory_space<vmem>>, vector<512x128xf32>
      %c0_12 = arith.constant 0 : index
      %c0_13 = arith.constant 0 : index
      %13 = vector.load %arg4[%c0_12, %c0_13] : memref<1x128xf32, #tpu.memory_space<vmem>>, vector<1x128xf32>
      %14 = vector.broadcast %13 : vector<1x128xf32> to vector<512x128xf32>
      %15 = arith.mulf %12, %14 : vector<512x128xf32>
      %c0_14 = arith.constant 0 : index
      %c0_15 = arith.constant 0 : index
      %16 = vector.load %arg5[%c0_14, %c0_15] : memref<1x128xf32, #tpu.memory_space<vmem>>, vector<1x128xf32>
      %17 = vector.broadcast %16 : vector<1x128xf32> to vector<512x128xf32>
      %18 = arith.addf %15, %17 : vector<512x128xf32>
      %cst_16 = arith.constant 0.000000e+00 : f32
      %19 = vector.broadcast %cst_16 : f32 to vector<512x128xf32>
      %20 = arith.maximumf %18, %19 : vector<512x128xf32>
      %21 = arith.truncf %20 : vector<512x128xf32> to vector<512x128xbf16>
      %c0_17 = arith.constant 0 : index
      %c0_18 = arith.constant 0 : index
      %22 = vector.load %arg6[%c0_17, %c0_18] : memref<512x128xbf16, #tpu.memory_space<vmem>>, vector<512x128xbf16>
      tpu.vector_store %arg6[%c0_17, %c0_18], %21 {strides = array<i32>} : memref<512x128xbf16, #tpu.memory_space<vmem>>, vector<512x128xbf16>,
    } else {
    }
    return
  }
  func.func @transform_0(%arg0: i32, %arg1: i32) -> (i32, i32) {
    %c0_i32 = arith.constant 0 : i32
    return %arg0, %arg1 : i32, i32
  }
  func.func @transform_1(%arg0: i32, %arg1: i32) -> (i32, i32) {
    %c0_i32 = arith.constant 0 : i32
    %c0_i32_0 = arith.constant 0 : i32
    return %arg1, %c0_i32 : i32, i32
  }
  func.func @transform_2(%arg0: i32, %arg1: i32) -> (i32, i32) {
    %c0_i32 = arith.constant 0 : i32
    %c0_i32_0 = arith.constant 0 : i32
    %c0_i32_1 = arith.constant 0 : i32
    return %c0_i32, %c0_i32_0 : i32, i32
  }
  func.func @transform_3(%arg0: i32, %arg1: i32) -> (i32, i32) {
    %c0_i32 = arith.constant 0 : i32
    %c0_i32_0 = arith.constant 0 : i32
    %c0_i32_1 = arith.constant 0 : i32
    return %c0_i32, %c0_i32_0 : i32, i32
  }
  func.func @transform_4(%arg0: i32, %arg1: i32) -> (i32, i32) {
    %c0_i32 = arith.constant 0 : i32
    %c0_i32_0 = arith.constant 0 : i32
    return %arg0, %c0_i32 : i32, i32
  }
}

module attributes {stable_mosaic.version = 11 : i64} {
  func.func @kernel(%arg0: i32, %arg1: i32, %arg2: memref<512x896xbf16, #tpu.memory_space<vmem>>, %arg3: memref<896x128xbf16, #tpu.memory_space<vmem>>, %arg4: memref<1x128xf32, #tpu.memory_space<vmem>>, %arg5: memref<1x128xf32, #tpu.memory_space<vmem>>, %arg6: memref<512x128xbf16, #tpu.memory_space<vmem>>, %arg7: memref<512x128xf32, #tpu.memory_space<vmem>>) attributes {dimension_semantics = [#tpu.dimension_semantics<parallel>, #tpu.dimension_semantics<arbitrary>], iteration_bounds = array<i64: 16, 1>, scalar_prefetch = 0 : i64, scratch_operands = 1 : i64, tpu.core_type = #tpu.core_type<tc>, window_params = [{transform_indices = @transform_0, window_bounds = array<i64: 512, 896>}, {transform_indices = @transform_1, window_bounds = array<i64: 896, 128>}, {pipeline_mode = #tpu.pipeline_mode<synchronous>, transform_indices = @transform_2, window_bounds = array<i64: 1, 128>}, {pipeline_mode = #tpu.pipeline_mode<synchronous>, transform_indices = @transform_3, window_bounds = array<i64: 1, 128>}, {transform_indices = @transform_4, window_bounds = array<i64: 512, 128>}]} {
    %c0_i32 = arith.constant 0 : i32
    %0 = arith.cmpi eq, %arg1, %c0_i32 : i32
    %1 = arith.extui %0 : i1 to i32
    %c0_i32_0 = arith.constant 0 : i32
    %2 = arith.cmpi ne, %1, %c0_i32_0 : i32
    scf.if %2 {
      %cst_10 = arith.constant 0.000000e+00 : f32
      %12 = vector.broadcast %cst_10 : f32 to vector<512x128xf32>
      %c0_11 = arith.constant 0 : index
      %c0_12 = arith.constant 0 : index
      %13 = vector.load %arg7[%c0_11, %c0_12] : memref<512x128xf32, #tpu.memory_space<vmem>>, vector<512x128xf32>
      tpu.vector_store %arg7[%c0_11, %c0_12], %12 {strides = array<i32>} : memref<512x128xf32, #tpu.memory_space<vmem>>, vector<512x128xf32>,
    } else {
    }
    %c0 = arith.constant 0 : index
    %c0_1 = arith.constant 0 : index
    %3 = vector.load %arg7[%c0, %c0_1] : memref<512x128xf32, #tpu.memory_space<vmem>>, vector<512x128xf32>
    %c0_2 = arith.constant 0 : index
    %c0_3 = arith.constant 0 : index
    %4 = vector.load %arg2[%c0_2, %c0_3] : memref<512x896xbf16, #tpu.memory_space<vmem>>, vector<512x896xbf16>
    %c0_4 = arith.constant 0 : index
    %c0_5 = arith.constant 0 : index
    %5 = vector.load %arg3[%c0_4, %c0_5] : memref<896x128xbf16, #tpu.memory_space<vmem>>, vector<896x128xbf16>
    %cst = arith.constant dense<0.000000e+00> : vector<512x128xf32>
    %6 = tpu.matmul %4, %5, %cst {dimension_numbers = #tpu.dot_dimension_numbers<[1], [0], [0], [1], [0, 0, 1, 1], [], []>} : vector<512x896xbf16>, vector<896x128xbf16>, vector<512x128xf32> -> vector<512x128xf32>
    %7 = arith.addf %3, %6 : vector<512x128xf32>
    %c0_6 = arith.constant 0 : index
    %c0_7 = arith.constant 0 : index
    %8 = vector.load %arg7[%c0_6, %c0_7] : memref<512x128xf32, #tpu.memory_space<vmem>>, vector<512x128xf32>
    tpu.vector_store %arg7[%c0_6, %c0_7], %7 {strides = array<i32>} : memref<512x128xf32, #tpu.memory_space<vmem>>, vector<512x128xf32>,
    %c0_i32_8 = arith.constant 0 : i32
    %9 = arith.cmpi eq, %arg1, %c0_i32_8 : i32
    %10 = arith.extui %9 : i1 to i32
    %c0_i32_9 = arith.constant 0 : i32
    %11 = arith.cmpi ne, %10, %c0_i32_9 : i32
    scf.if %11 {
      %c0_10 = arith.constant 0 : index
      %c0_11 = arith.constant 0 : index
      %12 = vector.load %arg7[%c0_10, %c0_11] : memref<512x128xf32, #tpu.memory_space<vmem>>, vector<512x128xf32>
      %c0_12 = arith.constant 0 : index
      %c0_13 = arith.constant 0 : index
      %13 = vector.load %arg4[%c0_12, %c0_13] : memref<1x128xf32, #tpu.memory_space<vmem>>, vector<1x128xf32>
      %14 = vector.broadcast %13 : vector<1x128xf32> to vector<512x128xf32>
      %15 = arith.mulf %12, %14 : vector<512x128xf32>
      %c0_14 = arith.constant 0 : index
      %c0_15 = arith.constant 0 : index
      %16 = vector.load %arg5[%c0_14, %c0_15] : memref<1x128xf32, #tpu.memory_space<vmem>>, vector<1x128xf32>
      %17 = vector.broadcast %16 : vector<1x128xf32> to vector<512x128xf32>
      %18 = arith.addf %15, %17 : vector<512x128xf32>
      %cst_16 = arith.constant 0.000000e+00 : f32
      %19 = vector.broadcast %cst_16 : f32 to vector<512x128xf32>
      %20 = arith.maximumf %18, %19 : vector<512x128xf32>
      %21 = arith.truncf %20 : vector<512x128xf32> to vector<512x128xbf16>
      %c0_17 = arith.constant 0 : index
      %c0_18 = arith.constant 0 : index
      %22 = vector.load %arg6[%c0_17, %c0_18] : memref<512x128xbf16, #tpu.memory_space<vmem>>, vector<512x128xbf16>
      tpu.vector_store %arg6[%c0_17, %c0_18], %21 {strides = array<i32>} : memref<512x128xbf16, #tpu.memory_space<vmem>>, vector<512x128xbf16>,
    } else {
    }
    return
  }
  func.func @transform_0(%arg0: i32, %arg1: i32) -> (i32, i32) {
    %c0_i32 = arith.constant 0 : i32
    return %arg0, %arg1 : i32, i32
  }
  func.func @transform_1(%arg0: i32, %arg1: i32) -> (i32, i32) {
    %c0_i32 = arith.constant 0 : i32
    %c0_i32_0 = arith.constant 0 : i32
    return %arg1, %c0_i32 : i32, i32
  }
  func.func @transform_2(%arg0: i32, %arg1: i32) -> (i32, i32) {
    %c0_i32 = arith.constant 0 : i32
    %c0_i32_0 = arith.constant 0 : i32
    %c0_i32_1 = arith.constant 0 : i32
    return %c0_i32, %c0_i32_0 : i32, i32
  }
  func.func @transform_3(%arg0: i32, %arg1: i32) -> (i32, i32) {
    %c0_i32 = arith.constant 0 : i32
    %c0_i32_0 = arith.constant 0 : i32
    %c0_i32_1 = arith.constant 0 : i32
    return %c0_i32, %c0_i32_0 : i32, i32
  }
  func.func @transform_4(%arg0: i32, %arg1: i32) -> (i32, i32) {
    %c0_i32 = arith.constant 0 : i32
    %c0_i32_0 = arith.constant 0 : i32
    return %arg0, %c0_i32 : i32, i32
  }
}

module attributes {stable_mosaic.version = 11 : i64} {
  func.func @kernel(%arg0: i32, %arg1: i32, %arg2: memref<512x1792xbf16, #tpu.memory_space<vmem>>, %arg3: memref<1792x128xbf16, #tpu.memory_space<vmem>>, %arg4: memref<1x128xf32, #tpu.memory_space<vmem>>, %arg5: memref<1x128xf32, #tpu.memory_space<vmem>>, %arg6: memref<512x128xbf16, #tpu.memory_space<vmem>>, %arg7: memref<512x128xf32, #tpu.memory_space<vmem>>) attributes {dimension_semantics = [#tpu.dimension_semantics<parallel>, #tpu.dimension_semantics<arbitrary>], iteration_bounds = array<i64: 2, 1>, scalar_prefetch = 0 : i64, scratch_operands = 1 : i64, tpu.core_type = #tpu.core_type<tc>, window_params = [{transform_indices = @transform_0, window_bounds = array<i64: 512, 1792>}, {transform_indices = @transform_1, window_bounds = array<i64: 1792, 128>}, {pipeline_mode = #tpu.pipeline_mode<synchronous>, transform_indices = @transform_2, window_bounds = array<i64: 1, 128>}, {pipeline_mode = #tpu.pipeline_mode<synchronous>, transform_indices = @transform_3, window_bounds = array<i64: 1, 128>}, {transform_indices = @transform_4, window_bounds = array<i64: 512, 128>}]} {
    %c0_i32 = arith.constant 0 : i32
    %0 = arith.cmpi eq, %arg1, %c0_i32 : i32
    %1 = arith.extui %0 : i1 to i32
    %c0_i32_0 = arith.constant 0 : i32
    %2 = arith.cmpi ne, %1, %c0_i32_0 : i32
    scf.if %2 {
      %cst_10 = arith.constant 0.000000e+00 : f32
      %12 = vector.broadcast %cst_10 : f32 to vector<512x128xf32>
      %c0_11 = arith.constant 0 : index
      %c0_12 = arith.constant 0 : index
      %13 = vector.load %arg7[%c0_11, %c0_12] : memref<512x128xf32, #tpu.memory_space<vmem>>, vector<512x128xf32>
      tpu.vector_store %arg7[%c0_11, %c0_12], %12 {strides = array<i32>} : memref<512x128xf32, #tpu.memory_space<vmem>>, vector<512x128xf32>,
    } else {
    }
    %c0 = arith.constant 0 : index
    %c0_1 = arith.constant 0 : index
    %3 = vector.load %arg7[%c0, %c0_1] : memref<512x128xf32, #tpu.memory_space<vmem>>, vector<512x128xf32>
    %c0_2 = arith.constant 0 : index
    %c0_3 = arith.constant 0 : index
    %4 = vector.load %arg2[%c0_2, %c0_3] : memref<512x1792xbf16, #tpu.memory_space<vmem>>, vector<512x1792xbf16>
    %c0_4 = arith.constant 0 : index
    %c0_5 = arith.constant 0 : index
    %5 = vector.load %arg3[%c0_4, %c0_5] : memref<1792x128xbf16, #tpu.memory_space<vmem>>, vector<1792x128xbf16>
    %cst = arith.constant dense<0.000000e+00> : vector<512x128xf32>
    %6 = tpu.matmul %4, %5, %cst {dimension_numbers = #tpu.dot_dimension_numbers<[1], [0], [0], [1], [0, 0, 1, 1], [], []>} : vector<512x1792xbf16>, vector<1792x128xbf16>, vector<512x128xf32> -> vector<512x128xf32>
    %7 = arith.addf %3, %6 : vector<512x128xf32>
    %c0_6 = arith.constant 0 : index
    %c0_7 = arith.constant 0 : index
    %8 = vector.load %arg7[%c0_6, %c0_7] : memref<512x128xf32, #tpu.memory_space<vmem>>, vector<512x128xf32>
    tpu.vector_store %arg7[%c0_6, %c0_7], %7 {strides = array<i32>} : memref<512x128xf32, #tpu.memory_space<vmem>>, vector<512x128xf32>,
    %c0_i32_8 = arith.constant 0 : i32
    %9 = arith.cmpi eq, %arg1, %c0_i32_8 : i32
    %10 = arith.extui %9 : i1 to i32
    %c0_i32_9 = arith.constant 0 : i32
    %11 = arith.cmpi ne, %10, %c0_i32_9 : i32
    scf.if %11 {
      %c0_10 = arith.constant 0 : index
      %c0_11 = arith.constant 0 : index
      %12 = vector.load %arg7[%c0_10, %c0_11] : memref<512x128xf32, #tpu.memory_space<vmem>>, vector<512x128xf32>
      %c0_12 = arith.constant 0 : index
      %c0_13 = arith.constant 0 : index
      %13 = vector.load %arg4[%c0_12, %c0_13] : memref<1x128xf32, #tpu.memory_space<vmem>>, vector<1x128xf32>
      %14 = vector.broadcast %13 : vector<1x128xf32> to vector<512x128xf32>
      %15 = arith.mulf %12, %14 : vector<512x128xf32>
      %c0_14 = arith.constant 0 : index
      %c0_15 = arith.constant 0 : index
      %16 = vector.load %arg5[%c0_14, %c0_15] : memref<1x128xf32, #tpu.memory_space<vmem>>, vector<1x128xf32>
      %17 = vector.broadcast %16 : vector<1x128xf32> to vector<512x128xf32>
      %18 = arith.addf %15, %17 : vector<512x128xf32>
      %cst_16 = arith.constant 0.000000e+00 : f32
      %19 = vector.broadcast %cst_16 : f32 to vector<512x128xf32>
      %20 = arith.maximumf %18, %19 : vector<512x128xf32>
      %21 = arith.truncf %20 : vector<512x128xf32> to vector<512x128xbf16>
      %c0_17 = arith.constant 0 : index
      %c0_18 = arith.constant 0 : index
      %22 = vector.load %arg6[%c0_17, %c0_18] : memref<512x128xbf16, #tpu.memory_space<vmem>>, vector<512x128xbf16>
      tpu.vector_store %arg6[%c0_17, %c0_18], %21 {strides = array<i32>} : memref<512x128xbf16, #tpu.memory_space<vmem>>, vector<512x128xbf16>,
    } else {
    }
    return
  }
  func.func @transform_0(%arg0: i32, %arg1: i32) -> (i32, i32) {
    %c0_i32 = arith.constant 0 : i32
    return %arg0, %arg1 : i32, i32
  }
  func.func @transform_1(%arg0: i32, %arg1: i32) -> (i32, i32) {
    %c0_i32 = arith.constant 0 : i32
    %c0_i32_0 = arith.constant 0 : i32
    return %arg1, %c0_i32 : i32, i32
  }
  func.func @transform_2(%arg0: i32, %arg1: i32) -> (i32, i32) {
    %c0_i32 = arith.constant 0 : i32
    %c0_i32_0 = arith.constant 0 : i32
    %c0_i32_1 = arith.constant 0 : i32
    return %c0_i32, %c0_i32_0 : i32, i32
  }
  func.func @transform_3(%arg0: i32, %arg1: i32) -> (i32, i32) {
    %c0_i32 = arith.constant 0 : i32
    %c0_i32_0 = arith.constant 0 : i32
    %c0_i32_1 = arith.constant 0 : i32
    return %c0_i32, %c0_i32_0 : i32, i32
  }
  func.func @transform_4(%arg0: i32, %arg1: i32) -> (i32, i32) {
    %c0_i32 = arith.constant 0 : i32
    %c0_i32_0 = arith.constant 0 : i32
    return %arg0, %c0_i32 : i32, i32
  }
}

module attributes {stable_mosaic.version = 11 : i64} {
  func.func @kernel(%arg0: i32, %arg1: i32, %arg2: memref<128x1792xbf16, #tpu.memory_space<vmem>>, %arg3: memref<1792x128xbf16, #tpu.memory_space<vmem>>, %arg4: memref<1x128xf32, #tpu.memory_space<vmem>>, %arg5: memref<1x128xf32, #tpu.memory_space<vmem>>, %arg6: memref<128x128xbf16, #tpu.memory_space<vmem>>, %arg7: memref<128x128xf32, #tpu.memory_space<vmem>>) attributes {dimension_semantics = [#tpu.dimension_semantics<parallel>, #tpu.dimension_semantics<arbitrary>], iteration_bounds = array<i64: 1, 2>, scalar_prefetch = 0 : i64, scratch_operands = 1 : i64, tpu.core_type = #tpu.core_type<tc>, window_params = [{transform_indices = @transform_0, window_bounds = array<i64: 128, 1792>}, {transform_indices = @transform_1, window_bounds = array<i64: 1792, 128>}, {pipeline_mode = #tpu.pipeline_mode<synchronous>, transform_indices = @transform_2, window_bounds = array<i64: 1, 128>}, {pipeline_mode = #tpu.pipeline_mode<synchronous>, transform_indices = @transform_3, window_bounds = array<i64: 1, 128>}, {transform_indices = @transform_4, window_bounds = array<i64: 128, 128>}]} {
    %c0_i32 = arith.constant 0 : i32
    %0 = arith.cmpi eq, %arg1, %c0_i32 : i32
    %1 = arith.extui %0 : i1 to i32
    %c0_i32_0 = arith.constant 0 : i32
    %2 = arith.cmpi ne, %1, %c0_i32_0 : i32
    scf.if %2 {
      %cst_9 = arith.constant 0.000000e+00 : f32
      %12 = vector.broadcast %cst_9 : f32 to vector<128x128xf32>
      %c0_10 = arith.constant 0 : index
      %c0_11 = arith.constant 0 : index
      %13 = vector.load %arg7[%c0_10, %c0_11] : memref<128x128xf32, #tpu.memory_space<vmem>>, vector<128x128xf32>
      tpu.vector_store %arg7[%c0_10, %c0_11], %12 {strides = array<i32>} : memref<128x128xf32, #tpu.memory_space<vmem>>, vector<128x128xf32>,
    } else {
    }
    %c0 = arith.constant 0 : index
    %c0_1 = arith.constant 0 : index
    %3 = vector.load %arg7[%c0, %c0_1] : memref<128x128xf32, #tpu.memory_space<vmem>>, vector<128x128xf32>
    %c0_2 = arith.constant 0 : index
    %c0_3 = arith.constant 0 : index
    %4 = vector.load %arg2[%c0_2, %c0_3] : memref<128x1792xbf16, #tpu.memory_space<vmem>>, vector<128x1792xbf16>
    %c0_4 = arith.constant 0 : index
    %c0_5 = arith.constant 0 : index
    %5 = vector.load %arg3[%c0_4, %c0_5] : memref<1792x128xbf16, #tpu.memory_space<vmem>>, vector<1792x128xbf16>
    %cst = arith.constant dense<0.000000e+00> : vector<128x128xf32>
    %6 = tpu.matmul %4, %5, %cst {dimension_numbers = #tpu.dot_dimension_numbers<[1], [0], [0], [1], [0, 0, 1, 1], [], []>} : vector<128x1792xbf16>, vector<1792x128xbf16>, vector<128x128xf32> -> vector<128x128xf32>
    %7 = arith.addf %3, %6 : vector<128x128xf32>
    %c0_6 = arith.constant 0 : index
    %c0_7 = arith.constant 0 : index
    %8 = vector.load %arg7[%c0_6, %c0_7] : memref<128x128xf32, #tpu.memory_space<vmem>>, vector<128x128xf32>
    tpu.vector_store %arg7[%c0_6, %c0_7], %7 {strides = array<i32>} : memref<128x128xf32, #tpu.memory_space<vmem>>, vector<128x128xf32>,
    %c1_i32 = arith.constant 1 : i32
    %9 = arith.cmpi eq, %arg1, %c1_i32 : i32
    %10 = arith.extui %9 : i1 to i32
    %c0_i32_8 = arith.constant 0 : i32
    %11 = arith.cmpi ne, %10, %c0_i32_8 : i32
    scf.if %11 {
      %c0_9 = arith.constant 0 : index
      %c0_10 = arith.constant 0 : index
      %12 = vector.load %arg7[%c0_9, %c0_10] : memref<128x128xf32, #tpu.memory_space<vmem>>, vector<128x128xf32>
      %c0_11 = arith.constant 0 : index
      %c0_12 = arith.constant 0 : index
      %13 = vector.load %arg4[%c0_11, %c0_12] : memref<1x128xf32, #tpu.memory_space<vmem>>, vector<1x128xf32>
      %14 = vector.broadcast %13 : vector<1x128xf32> to vector<128x128xf32>
      %15 = arith.mulf %12, %14 : vector<128x128xf32>
      %c0_13 = arith.constant 0 : index
      %c0_14 = arith.constant 0 : index
      %16 = vector.load %arg5[%c0_13, %c0_14] : memref<1x128xf32, #tpu.memory_space<vmem>>, vector<1x128xf32>
      %17 = vector.broadcast %16 : vector<1x128xf32> to vector<128x128xf32>
      %18 = arith.addf %15, %17 : vector<128x128xf32>
      %cst_15 = arith.constant 0.000000e+00 : f32
      %19 = vector.broadcast %cst_15 : f32 to vector<128x128xf32>
      %20 = arith.maximumf %18, %19 : vector<128x128xf32>
      %21 = arith.truncf %20 : vector<128x128xf32> to vector<128x128xbf16>
      %c0_16 = arith.constant 0 : index
      %c0_17 = arith.constant 0 : index
      %22 = vector.load %arg6[%c0_16, %c0_17] : memref<128x128xbf16, #tpu.memory_space<vmem>>, vector<128x128xbf16>
      tpu.vector_store %arg6[%c0_16, %c0_17], %21 {strides = array<i32>} : memref<128x128xbf16, #tpu.memory_space<vmem>>, vector<128x128xbf16>,
    } else {
    }
    return
  }
  func.func @transform_0(%arg0: i32, %arg1: i32) -> (i32, i32) {
    %c0_i32 = arith.constant 0 : i32
    return %arg0, %arg1 : i32, i32
  }
  func.func @transform_1(%arg0: i32, %arg1: i32) -> (i32, i32) {
    %c0_i32 = arith.constant 0 : i32
    %c0_i32_0 = arith.constant 0 : i32
    return %arg1, %c0_i32 : i32, i32
  }
  func.func @transform_2(%arg0: i32, %arg1: i32) -> (i32, i32) {
    %c0_i32 = arith.constant 0 : i32
    %c0_i32_0 = arith.constant 0 : i32
    %c0_i32_1 = arith.constant 0 : i32
    return %c0_i32, %c0_i32_0 : i32, i32
  }
  func.func @transform_3(%arg0: i32, %arg1: i32) -> (i32, i32) {
    %c0_i32 = arith.constant 0 : i32
    %c0_i32_0 = arith.constant 0 : i32
    %c0_i32_1 = arith.constant 0 : i32
    return %c0_i32, %c0_i32_0 : i32, i32
  }
  func.func @transform_4(%arg0: i32, %arg1: i32) -> (i32, i32) {
    %c0_i32 = arith.constant 0 : i32
    %c0_i32_0 = arith.constant 0 : i32
    return %arg0, %c0_i32 : i32, i32
  }
}

module attributes {stable_mosaic.version = 11 : i64} {
  func.func @kernel(%arg0: i32, %arg1: i32, %arg2: memref<128x1792xbf16, #tpu.memory_space<vmem>>, %arg3: memref<1792x256xbf16, #tpu.memory_space<vmem>>, %arg4: memref<1x256xf32, #tpu.memory_space<vmem>>, %arg5: memref<1x256xf32, #tpu.memory_space<vmem>>, %arg6: memref<128x256xbf16, #tpu.memory_space<vmem>>, %arg7: memref<128x256xf32, #tpu.memory_space<vmem>>) attributes {dimension_semantics = [#tpu.dimension_semantics<parallel>, #tpu.dimension_semantics<arbitrary>], iteration_bounds = array<i64: 1, 2>, scalar_prefetch = 0 : i64, scratch_operands = 1 : i64, tpu.core_type = #tpu.core_type<tc>, window_params = [{transform_indices = @transform_0, window_bounds = array<i64: 128, 1792>}, {transform_indices = @transform_1, window_bounds = array<i64: 1792, 256>}, {pipeline_mode = #tpu.pipeline_mode<synchronous>, transform_indices = @transform_2, window_bounds = array<i64: 1, 256>}, {pipeline_mode = #tpu.pipeline_mode<synchronous>, transform_indices = @transform_3, window_bounds = array<i64: 1, 256>}, {transform_indices = @transform_4, window_bounds = array<i64: 128, 256>}]} {
    %c0_i32 = arith.constant 0 : i32
    %0 = arith.cmpi eq, %arg1, %c0_i32 : i32
    %1 = arith.extui %0 : i1 to i32
    %c0_i32_0 = arith.constant 0 : i32
    %2 = arith.cmpi ne, %1, %c0_i32_0 : i32
    scf.if %2 {
      %cst_9 = arith.constant 0.000000e+00 : f32
      %12 = vector.broadcast %cst_9 : f32 to vector<128x256xf32>
      %c0_10 = arith.constant 0 : index
      %c0_11 = arith.constant 0 : index
      %13 = vector.load %arg7[%c0_10, %c0_11] : memref<128x256xf32, #tpu.memory_space<vmem>>, vector<128x256xf32>
      tpu.vector_store %arg7[%c0_10, %c0_11], %12 {strides = array<i32>} : memref<128x256xf32, #tpu.memory_space<vmem>>, vector<128x256xf32>,
    } else {
    }
    %c0 = arith.constant 0 : index
    %c0_1 = arith.constant 0 : index
    %3 = vector.load %arg7[%c0, %c0_1] : memref<128x256xf32, #tpu.memory_space<vmem>>, vector<128x256xf32>
    %c0_2 = arith.constant 0 : index
    %c0_3 = arith.constant 0 : index
    %4 = vector.load %arg2[%c0_2, %c0_3] : memref<128x1792xbf16, #tpu.memory_space<vmem>>, vector<128x1792xbf16>
    %c0_4 = arith.constant 0 : index
    %c0_5 = arith.constant 0 : index
    %5 = vector.load %arg3[%c0_4, %c0_5] : memref<1792x256xbf16, #tpu.memory_space<vmem>>, vector<1792x256xbf16>
    %cst = arith.constant dense<0.000000e+00> : vector<128x256xf32>
    %6 = tpu.matmul %4, %5, %cst {dimension_numbers = #tpu.dot_dimension_numbers<[1], [0], [0], [1], [0, 0, 1, 1], [], []>} : vector<128x1792xbf16>, vector<1792x256xbf16>, vector<128x256xf32> -> vector<128x256xf32>
    %7 = arith.addf %3, %6 : vector<128x256xf32>
    %c0_6 = arith.constant 0 : index
    %c0_7 = arith.constant 0 : index
    %8 = vector.load %arg7[%c0_6, %c0_7] : memref<128x256xf32, #tpu.memory_space<vmem>>, vector<128x256xf32>
    tpu.vector_store %arg7[%c0_6, %c0_7], %7 {strides = array<i32>} : memref<128x256xf32, #tpu.memory_space<vmem>>, vector<128x256xf32>,
    %c1_i32 = arith.constant 1 : i32
    %9 = arith.cmpi eq, %arg1, %c1_i32 : i32
    %10 = arith.extui %9 : i1 to i32
    %c0_i32_8 = arith.constant 0 : i32
    %11 = arith.cmpi ne, %10, %c0_i32_8 : i32
    scf.if %11 {
      %c0_9 = arith.constant 0 : index
      %c0_10 = arith.constant 0 : index
      %12 = vector.load %arg7[%c0_9, %c0_10] : memref<128x256xf32, #tpu.memory_space<vmem>>, vector<128x256xf32>
      %c0_11 = arith.constant 0 : index
      %c0_12 = arith.constant 0 : index
      %13 = vector.load %arg4[%c0_11, %c0_12] : memref<1x256xf32, #tpu.memory_space<vmem>>, vector<1x256xf32>
      %14 = vector.broadcast %13 : vector<1x256xf32> to vector<128x256xf32>
      %15 = arith.mulf %12, %14 : vector<128x256xf32>
      %c0_13 = arith.constant 0 : index
      %c0_14 = arith.constant 0 : index
      %16 = vector.load %arg5[%c0_13, %c0_14] : memref<1x256xf32, #tpu.memory_space<vmem>>, vector<1x256xf32>
      %17 = vector.broadcast %16 : vector<1x256xf32> to vector<128x256xf32>
      %18 = arith.addf %15, %17 : vector<128x256xf32>
      %cst_15 = arith.constant 0.000000e+00 : f32
      %19 = vector.broadcast %cst_15 : f32 to vector<128x256xf32>
      %20 = arith.maximumf %18, %19 : vector<128x256xf32>
      %21 = arith.truncf %20 : vector<128x256xf32> to vector<128x256xbf16>
      %c0_16 = arith.constant 0 : index
      %c0_17 = arith.constant 0 : index
      %22 = vector.load %arg6[%c0_16, %c0_17] : memref<128x256xbf16, #tpu.memory_space<vmem>>, vector<128x256xbf16>
      tpu.vector_store %arg6[%c0_16, %c0_17], %21 {strides = array<i32>} : memref<128x256xbf16, #tpu.memory_space<vmem>>, vector<128x256xbf16>,
    } else {
    }
    return
  }
  func.func @transform_0(%arg0: i32, %arg1: i32) -> (i32, i32) {
    %c0_i32 = arith.constant 0 : i32
    return %arg0, %arg1 : i32, i32
  }
  func.func @transform_1(%arg0: i32, %arg1: i32) -> (i32, i32) {
    %c0_i32 = arith.constant 0 : i32
    %c0_i32_0 = arith.constant 0 : i32
    return %arg1, %c0_i32 : i32, i32
  }
  func.func @transform_2(%arg0: i32, %arg1: i32) -> (i32, i32) {
    %c0_i32 = arith.constant 0 : i32
    %c0_i32_0 = arith.constant 0 : i32
    %c0_i32_1 = arith.constant 0 : i32
    return %c0_i32, %c0_i32_0 : i32, i32
  }
  func.func @transform_3(%arg0: i32, %arg1: i32) -> (i32, i32) {
    %c0_i32 = arith.constant 0 : i32
    %c0_i32_0 = arith.constant 0 : i32
    %c0_i32_1 = arith.constant 0 : i32
    return %c0_i32, %c0_i32_0 : i32, i32
  }
  func.func @transform_4(%arg0: i32, %arg1: i32) -> (i32, i32) {
    %c0_i32 = arith.constant 0 : i32
    %c0_i32_0 = arith.constant 0 : i32
    return %arg0, %c0_i32 : i32, i32
  }
}

module attributes {stable_mosaic.version = 11 : i64} {
  func.func @kernel(%arg0: i32, %arg1: i32, %arg2: memref<16x1792xbf16, #tpu.memory_space<vmem>>, %arg3: memref<1792x256xbf16, #tpu.memory_space<vmem>>, %arg4: memref<1x256xf32, #tpu.memory_space<vmem>>, %arg5: memref<1x256xf32, #tpu.memory_space<vmem>>, %arg6: memref<16x256xbf16, #tpu.memory_space<vmem>>, %arg7: memref<16x256xf32, #tpu.memory_space<vmem>>) attributes {dimension_semantics = [#tpu.dimension_semantics<parallel>, #tpu.dimension_semantics<arbitrary>], iteration_bounds = array<i64: 1, 4>, scalar_prefetch = 0 : i64, scratch_operands = 1 : i64, tpu.core_type = #tpu.core_type<tc>, window_params = [{transform_indices = @transform_0, window_bounds = array<i64: 16, 1792>}, {transform_indices = @transform_1, window_bounds = array<i64: 1792, 256>}, {pipeline_mode = #tpu.pipeline_mode<synchronous>, transform_indices = @transform_2, window_bounds = array<i64: 1, 256>}, {pipeline_mode = #tpu.pipeline_mode<synchronous>, transform_indices = @transform_3, window_bounds = array<i64: 1, 256>}, {transform_indices = @transform_4, window_bounds = array<i64: 16, 256>}]} {
    %c0_i32 = arith.constant 0 : i32
    %0 = arith.cmpi eq, %arg1, %c0_i32 : i32
    %1 = arith.extui %0 : i1 to i32
    %c0_i32_0 = arith.constant 0 : i32
    %2 = arith.cmpi ne, %1, %c0_i32_0 : i32
    scf.if %2 {
      %cst_9 = arith.constant 0.000000e+00 : f32
      %12 = vector.broadcast %cst_9 : f32 to vector<16x256xf32>
      %c0_10 = arith.constant 0 : index
      %c0_11 = arith.constant 0 : index
      %13 = vector.load %arg7[%c0_10, %c0_11] : memref<16x256xf32, #tpu.memory_space<vmem>>, vector<16x256xf32>
      tpu.vector_store %arg7[%c0_10, %c0_11], %12 {strides = array<i32>} : memref<16x256xf32, #tpu.memory_space<vmem>>, vector<16x256xf32>,
    } else {
    }
    %c0 = arith.constant 0 : index
    %c0_1 = arith.constant 0 : index
    %3 = vector.load %arg7[%c0, %c0_1] : memref<16x256xf32, #tpu.memory_space<vmem>>, vector<16x256xf32>
    %c0_2 = arith.constant 0 : index
    %c0_3 = arith.constant 0 : index
    %4 = vector.load %arg2[%c0_2, %c0_3] : memref<16x1792xbf16, #tpu.memory_space<vmem>>, vector<16x1792xbf16>
    %c0_4 = arith.constant 0 : index
    %c0_5 = arith.constant 0 : index
    %5 = vector.load %arg3[%c0_4, %c0_5] : memref<1792x256xbf16, #tpu.memory_space<vmem>>, vector<1792x256xbf16>
    %cst = arith.constant dense<0.000000e+00> : vector<16x256xf32>
    %6 = tpu.matmul %4, %5, %cst {dimension_numbers = #tpu.dot_dimension_numbers<[1], [0], [0], [1], [0, 0, 1, 1], [], []>} : vector<16x1792xbf16>, vector<1792x256xbf16>, vector<16x256xf32> -> vector<16x256xf32>
    %7 = arith.addf %3, %6 : vector<16x256xf32>
    %c0_6 = arith.constant 0 : index
    %c0_7 = arith.constant 0 : index
    %8 = vector.load %arg7[%c0_6, %c0_7] : memref<16x256xf32, #tpu.memory_space<vmem>>, vector<16x256xf32>
    tpu.vector_store %arg7[%c0_6, %c0_7], %7 {strides = array<i32>} : memref<16x256xf32, #tpu.memory_space<vmem>>, vector<16x256xf32>,
    %c3_i32 = arith.constant 3 : i32
    %9 = arith.cmpi eq, %arg1, %c3_i32 : i32
    %10 = arith.extui %9 : i1 to i32
    %c0_i32_8 = arith.constant 0 : i32
    %11 = arith.cmpi ne, %10, %c0_i32_8 : i32
    scf.if %11 {
      %c0_9 = arith.constant 0 : index
      %c0_10 = arith.constant 0 : index
      %12 = vector.load %arg7[%c0_9, %c0_10] : memref<16x256xf32, #tpu.memory_space<vmem>>, vector<16x256xf32>
      %c0_11 = arith.constant 0 : index
      %c0_12 = arith.constant 0 : index
      %13 = vector.load %arg4[%c0_11, %c0_12] : memref<1x256xf32, #tpu.memory_space<vmem>>, vector<1x256xf32>
      %14 = vector.broadcast %13 : vector<1x256xf32> to vector<16x256xf32>
      %15 = arith.mulf %12, %14 : vector<16x256xf32>
      %c0_13 = arith.constant 0 : index
      %c0_14 = arith.constant 0 : index
      %16 = vector.load %arg5[%c0_13, %c0_14] : memref<1x256xf32, #tpu.memory_space<vmem>>, vector<1x256xf32>
      %17 = vector.broadcast %16 : vector<1x256xf32> to vector<16x256xf32>
      %18 = arith.addf %15, %17 : vector<16x256xf32>
      %cst_15 = arith.constant 0.000000e+00 : f32
      %19 = vector.broadcast %cst_15 : f32 to vector<16x256xf32>
      %20 = arith.maximumf %18, %19 : vector<16x256xf32>
      %21 = arith.truncf %20 : vector<16x256xf32> to vector<16x256xbf16>
      %c0_16 = arith.constant 0 : index
      %c0_17 = arith.constant 0 : index
      %22 = vector.load %arg6[%c0_16, %c0_17] : memref<16x256xbf16, #tpu.memory_space<vmem>>, vector<16x256xbf16>
      tpu.vector_store %arg6[%c0_16, %c0_17], %21 {strides = array<i32>} : memref<16x256xbf16, #tpu.memory_space<vmem>>, vector<16x256xbf16>,
    } else {
    }
    return
  }
  func.func @transform_0(%arg0: i32, %arg1: i32) -> (i32, i32) {
    %c0_i32 = arith.constant 0 : i32
    return %arg0, %arg1 : i32, i32
  }
  func.func @transform_1(%arg0: i32, %arg1: i32) -> (i32, i32) {
    %c0_i32 = arith.constant 0 : i32
    %c0_i32_0 = arith.constant 0 : i32
    return %arg1, %c0_i32 : i32, i32
  }
  func.func @transform_2(%arg0: i32, %arg1: i32) -> (i32, i32) {
    %c0_i32 = arith.constant 0 : i32
    %c0_i32_0 = arith.constant 0 : i32
    %c0_i32_1 = arith.constant 0 : i32
    return %c0_i32, %c0_i32_0 : i32, i32
  }
  func.func @transform_3(%arg0: i32, %arg1: i32) -> (i32, i32) {
    %c0_i32 = arith.constant 0 : i32
    %c0_i32_0 = arith.constant 0 : i32
    %c0_i32_1 = arith.constant 0 : i32
    return %c0_i32, %c0_i32_0 : i32, i32
  }
  func.func @transform_4(%arg0: i32, %arg1: i32) -> (i32, i32) {
    %c0_i32 = arith.constant 0 : i32
    %c0_i32_0 = arith.constant 0 : i32
    return %arg0, %c0_i32 : i32, i32
  }
}

module attributes {stable_mosaic.version = 11 : i64} {
  func.func @kernel(%arg0: i32, %arg1: i32, %arg2: memref<16x1792xbf16, #tpu.memory_space<vmem>>, %arg3: memref<1792x512xbf16, #tpu.memory_space<vmem>>, %arg4: memref<1x512xf32, #tpu.memory_space<vmem>>, %arg5: memref<1x512xf32, #tpu.memory_space<vmem>>, %arg6: memref<16x512xbf16, #tpu.memory_space<vmem>>, %arg7: memref<16x512xf32, #tpu.memory_space<vmem>>) attributes {dimension_semantics = [#tpu.dimension_semantics<parallel>, #tpu.dimension_semantics<arbitrary>], iteration_bounds = array<i64: 1, 4>, scalar_prefetch = 0 : i64, scratch_operands = 1 : i64, tpu.core_type = #tpu.core_type<tc>, window_params = [{transform_indices = @transform_0, window_bounds = array<i64: 16, 1792>}, {transform_indices = @transform_1, window_bounds = array<i64: 1792, 512>}, {pipeline_mode = #tpu.pipeline_mode<synchronous>, transform_indices = @transform_2, window_bounds = array<i64: 1, 512>}, {pipeline_mode = #tpu.pipeline_mode<synchronous>, transform_indices = @transform_3, window_bounds = array<i64: 1, 512>}, {transform_indices = @transform_4, window_bounds = array<i64: 16, 512>}]} {
    %c0_i32 = arith.constant 0 : i32
    %0 = arith.cmpi eq, %arg1, %c0_i32 : i32
    %1 = arith.extui %0 : i1 to i32
    %c0_i32_0 = arith.constant 0 : i32
    %2 = arith.cmpi ne, %1, %c0_i32_0 : i32
    scf.if %2 {
      %cst_9 = arith.constant 0.000000e+00 : f32
      %12 = vector.broadcast %cst_9 : f32 to vector<16x512xf32>
      %c0_10 = arith.constant 0 : index
      %c0_11 = arith.constant 0 : index
      %13 = vector.load %arg7[%c0_10, %c0_11] : memref<16x512xf32, #tpu.memory_space<vmem>>, vector<16x512xf32>
      tpu.vector_store %arg7[%c0_10, %c0_11], %12 {strides = array<i32>} : memref<16x512xf32, #tpu.memory_space<vmem>>, vector<16x512xf32>,
    } else {
    }
    %c0 = arith.constant 0 : index
    %c0_1 = arith.constant 0 : index
    %3 = vector.load %arg7[%c0, %c0_1] : memref<16x512xf32, #tpu.memory_space<vmem>>, vector<16x512xf32>
    %c0_2 = arith.constant 0 : index
    %c0_3 = arith.constant 0 : index
    %4 = vector.load %arg2[%c0_2, %c0_3] : memref<16x1792xbf16, #tpu.memory_space<vmem>>, vector<16x1792xbf16>
    %c0_4 = arith.constant 0 : index
    %c0_5 = arith.constant 0 : index
    %5 = vector.load %arg3[%c0_4, %c0_5] : memref<1792x512xbf16, #tpu.memory_space<vmem>>, vector<1792x512xbf16>
    %cst = arith.constant dense<0.000000e+00> : vector<16x512xf32>
    %6 = tpu.matmul %4, %5, %cst {dimension_numbers = #tpu.dot_dimension_numbers<[1], [0], [0], [1], [0, 0, 1, 1], [], []>} : vector<16x1792xbf16>, vector<1792x512xbf16>, vector<16x512xf32> -> vector<16x512xf32>
    %7 = arith.addf %3, %6 : vector<16x512xf32>
    %c0_6 = arith.constant 0 : index
    %c0_7 = arith.constant 0 : index
    %8 = vector.load %arg7[%c0_6, %c0_7] : memref<16x512xf32, #tpu.memory_space<vmem>>, vector<16x512xf32>
    tpu.vector_store %arg7[%c0_6, %c0_7], %7 {strides = array<i32>} : memref<16x512xf32, #tpu.memory_space<vmem>>, vector<16x512xf32>,
    %c3_i32 = arith.constant 3 : i32
    %9 = arith.cmpi eq, %arg1, %c3_i32 : i32
    %10 = arith.extui %9 : i1 to i32
    %c0_i32_8 = arith.constant 0 : i32
    %11 = arith.cmpi ne, %10, %c0_i32_8 : i32
    scf.if %11 {
      %c0_9 = arith.constant 0 : index
      %c0_10 = arith.constant 0 : index
      %12 = vector.load %arg7[%c0_9, %c0_10] : memref<16x512xf32, #tpu.memory_space<vmem>>, vector<16x512xf32>
      %c0_11 = arith.constant 0 : index
      %c0_12 = arith.constant 0 : index
      %13 = vector.load %arg4[%c0_11, %c0_12] : memref<1x512xf32, #tpu.memory_space<vmem>>, vector<1x512xf32>
      %14 = vector.broadcast %13 : vector<1x512xf32> to vector<16x512xf32>
      %15 = arith.mulf %12, %14 : vector<16x512xf32>
      %c0_13 = arith.constant 0 : index
      %c0_14 = arith.constant 0 : index
      %16 = vector.load %arg5[%c0_13, %c0_14] : memref<1x512xf32, #tpu.memory_space<vmem>>, vector<1x512xf32>
      %17 = vector.broadcast %16 : vector<1x512xf32> to vector<16x512xf32>
      %18 = arith.addf %15, %17 : vector<16x512xf32>
      %cst_15 = arith.constant 0.000000e+00 : f32
      %19 = vector.broadcast %cst_15 : f32 to vector<16x512xf32>
      %20 = arith.maximumf %18, %19 : vector<16x512xf32>
      %21 = arith.truncf %20 : vector<16x512xf32> to vector<16x512xbf16>
      %c0_16 = arith.constant 0 : index
      %c0_17 = arith.constant 0 : index
      %22 = vector.load %arg6[%c0_16, %c0_17] : memref<16x512xbf16, #tpu.memory_space<vmem>>, vector<16x512xbf16>
      tpu.vector_store %arg6[%c0_16, %c0_17], %21 {strides = array<i32>} : memref<16x512xbf16, #tpu.memory_space<vmem>>, vector<16x512xbf16>,
    } else {
    }
    return
  }
  func.func @transform_0(%arg0: i32, %arg1: i32) -> (i32, i32) {
    %c0_i32 = arith.constant 0 : i32
    return %arg0, %arg1 : i32, i32
  }
  func.func @transform_1(%arg0: i32, %arg1: i32) -> (i32, i32) {
    %c0_i32 = arith.constant 0 : i32
    %c0_i32_0 = arith.constant 0 : i32
    return %arg1, %c0_i32 : i32, i32
  }
  func.func @transform_2(%arg0: i32, %arg1: i32) -> (i32, i32) {
    %c0_i32 = arith.constant 0 : i32
    %c0_i32_0 = arith.constant 0 : i32
    %c0_i32_1 = arith.constant 0 : i32
    return %c0_i32, %c0_i32_0 : i32, i32
  }
  func.func @transform_3(%arg0: i32, %arg1: i32) -> (i32, i32) {
    %c0_i32 = arith.constant 0 : i32
    %c0_i32_0 = arith.constant 0 : i32
    %c0_i32_1 = arith.constant 0 : i32
    return %c0_i32, %c0_i32_0 : i32, i32
  }
  func.func @transform_4(%arg0: i32, %arg1: i32) -> (i32, i32) {
    %c0_i32 = arith.constant 0 : i32
    %c0_i32_0 = arith.constant 0 : i32
    return %arg0, %c0_i32 : i32, i32
  }
}

module attributes {stable_mosaic.version = 11 : i64} {
  func.func @kernel(%arg0: i32, %arg1: i32, %arg2: memref<16x512xbf16, #tpu.memory_space<vmem>>, %arg3: memref<512x4096xbf16, #tpu.memory_space<vmem>>, %arg4: memref<1x4096xf32, #tpu.memory_space<vmem>>, %arg5: memref<16x4096xbf16, #tpu.memory_space<vmem>>, %arg6: memref<16x4096xf32, #tpu.memory_space<vmem>>) attributes {dimension_semantics = [#tpu.dimension_semantics<parallel>, #tpu.dimension_semantics<arbitrary>], iteration_bounds = array<i64: 1, 1>, scalar_prefetch = 0 : i64, scratch_operands = 1 : i64, tpu.core_type = #tpu.core_type<tc>, window_params = [{transform_indices = @transform_0, window_bounds = array<i64: 16, 512>}, {transform_indices = @transform_1, window_bounds = array<i64: 512, 4096>}, {pipeline_mode = #tpu.pipeline_mode<synchronous>, transform_indices = @transform_2, window_bounds = array<i64: 1, 4096>}, {transform_indices = @transform_3, window_bounds = array<i64: 16, 4096>}]} {
    %c0_i32 = arith.constant 0 : i32
    %0 = arith.cmpi eq, %arg1, %c0_i32 : i32
    %1 = arith.extui %0 : i1 to i32
    %c0_i32_0 = arith.constant 0 : i32
    %2 = arith.cmpi ne, %1, %c0_i32_0 : i32
    scf.if %2 {
      %cst_10 = arith.constant 0.000000e+00 : f32
      %12 = vector.broadcast %cst_10 : f32 to vector<16x4096xf32>
      %c0_11 = arith.constant 0 : index
      %c0_12 = arith.constant 0 : index
      %13 = vector.load %arg6[%c0_11, %c0_12] : memref<16x4096xf32, #tpu.memory_space<vmem>>, vector<16x4096xf32>
      tpu.vector_store %arg6[%c0_11, %c0_12], %12 {strides = array<i32>} : memref<16x4096xf32, #tpu.memory_space<vmem>>, vector<16x4096xf32>,
    } else {
    }
    %c0 = arith.constant 0 : index
    %c0_1 = arith.constant 0 : index
    %3 = vector.load %arg6[%c0, %c0_1] : memref<16x4096xf32, #tpu.memory_space<vmem>>, vector<16x4096xf32>
    %c0_2 = arith.constant 0 : index
    %c0_3 = arith.constant 0 : index
    %4 = vector.load %arg2[%c0_2, %c0_3] : memref<16x512xbf16, #tpu.memory_space<vmem>>, vector<16x512xbf16>
    %c0_4 = arith.constant 0 : index
    %c0_5 = arith.constant 0 : index
    %5 = vector.load %arg3[%c0_4, %c0_5] : memref<512x4096xbf16, #tpu.memory_space<vmem>>, vector<512x4096xbf16>
    %cst = arith.constant dense<0.000000e+00> : vector<16x4096xf32>
    %6 = tpu.matmul %4, %5, %cst {dimension_numbers = #tpu.dot_dimension_numbers<[1], [0], [0], [1], [0, 0, 1, 1], [], []>} : vector<16x512xbf16>, vector<512x4096xbf16>, vector<16x4096xf32> -> vector<16x4096xf32>
    %7 = arith.addf %3, %6 : vector<16x4096xf32>
    %c0_6 = arith.constant 0 : index
    %c0_7 = arith.constant 0 : index
    %8 = vector.load %arg6[%c0_6, %c0_7] : memref<16x4096xf32, #tpu.memory_space<vmem>>, vector<16x4096xf32>
    tpu.vector_store %arg6[%c0_6, %c0_7], %7 {strides = array<i32>} : memref<16x4096xf32, #tpu.memory_space<vmem>>, vector<16x4096xf32>,
    %c0_i32_8 = arith.constant 0 : i32
    %9 = arith.cmpi eq, %arg1, %c0_i32_8 : i32
    %10 = arith.extui %9 : i1 to i32
    %c0_i32_9 = arith.constant 0 : i32
    %11 = arith.cmpi ne, %10, %c0_i32_9 : i32
    scf.if %11 {
      %c0_10 = arith.constant 0 : index
      %c0_11 = arith.constant 0 : index
      %12 = vector.load %arg6[%c0_10, %c0_11] : memref<16x4096xf32, #tpu.memory_space<vmem>>, vector<16x4096xf32>
      %c0_12 = arith.constant 0 : index
      %c0_13 = arith.constant 0 : index
      %13 = vector.load %arg4[%c0_12, %c0_13] : memref<1x4096xf32, #tpu.memory_space<vmem>>, vector<1x4096xf32>
      %14 = vector.broadcast %13 : vector<1x4096xf32> to vector<16x4096xf32>
      %15 = arith.addf %12, %14 : vector<16x4096xf32>
      %16 = arith.truncf %15 : vector<16x4096xf32> to vector<16x4096xbf16>
      %c0_14 = arith.constant 0 : index
      %c0_15 = arith.constant 0 : index
      %17 = vector.load %arg5[%c0_14, %c0_15] : memref<16x4096xbf16, #tpu.memory_space<vmem>>, vector<16x4096xbf16>
      tpu.vector_store %arg5[%c0_14, %c0_15], %16 {strides = array<i32>} : memref<16x4096xbf16, #tpu.memory_space<vmem>>, vector<16x4096xbf16>,
    } else {
    }
    return
  }
  func.func @transform_0(%arg0: i32, %arg1: i32) -> (i32, i32) {
    %c0_i32 = arith.constant 0 : i32
    return %arg0, %arg1 : i32, i32
  }
  func.func @transform_1(%arg0: i32, %arg1: i32) -> (i32, i32) {
    %c0_i32 = arith.constant 0 : i32
    %c0_i32_0 = arith.constant 0 : i32
    return %arg1, %c0_i32 : i32, i32
  }
  func.func @transform_2(%arg0: i32, %arg1: i32) -> (i32, i32) {
    %c0_i32 = arith.constant 0 : i32
    %c0_i32_0 = arith.constant 0 : i32
    %c0_i32_1 = arith.constant 0 : i32
    return %c0_i32, %c0_i32_0 : i32, i32
  }
  func.func @transform_3(%arg0: i32, %arg1: i32) -> (i32, i32) {
    %c0_i32 = arith.constant 0 : i32
    %c0_i32_0 = arith.constant 0 : i32
    return %arg0, %c0_i32 : i32, i32
  }
}

module attributes {stable_mosaic.version = 11 : i64} {
  func.func @kernel(%arg0: i32, %arg1: i32, %arg2: memref<128x1920xbf16, #tpu.memory_space<vmem>>, %arg3: memref<1920x256xbf16, #tpu.memory_space<vmem>>, %arg4: memref<1x256xf32, #tpu.memory_space<vmem>>, %arg5: memref<1x256xf32, #tpu.memory_space<vmem>>, %arg6: memref<128x256xbf16, #tpu.memory_space<vmem>>, %arg7: memref<128x256xf32, #tpu.memory_space<vmem>>) attributes {dimension_semantics = [#tpu.dimension_semantics<parallel>, #tpu.dimension_semantics<arbitrary>], iteration_bounds = array<i64: 1, 11>, scalar_prefetch = 0 : i64, scratch_operands = 1 : i64, tpu.core_type = #tpu.core_type<tc>, window_params = [{transform_indices = @transform_0, window_bounds = array<i64: 128, 1920>}, {transform_indices = @transform_1, window_bounds = array<i64: 1920, 256>}, {pipeline_mode = #tpu.pipeline_mode<synchronous>, transform_indices = @transform_2, window_bounds = array<i64: 1, 256>}, {pipeline_mode = #tpu.pipeline_mode<synchronous>, transform_indices = @transform_3, window_bounds = array<i64: 1, 256>}, {transform_indices = @transform_4, window_bounds = array<i64: 128, 256>}]} {
    %c0_i32 = arith.constant 0 : i32
    %0 = arith.cmpi eq, %arg1, %c0_i32 : i32
    %1 = arith.extui %0 : i1 to i32
    %c0_i32_0 = arith.constant 0 : i32
    %2 = arith.cmpi ne, %1, %c0_i32_0 : i32
    scf.if %2 {
      %cst_9 = arith.constant 0.000000e+00 : f32
      %12 = vector.broadcast %cst_9 : f32 to vector<128x256xf32>
      %c0_10 = arith.constant 0 : index
      %c0_11 = arith.constant 0 : index
      %13 = vector.load %arg7[%c0_10, %c0_11] : memref<128x256xf32, #tpu.memory_space<vmem>>, vector<128x256xf32>
      tpu.vector_store %arg7[%c0_10, %c0_11], %12 {strides = array<i32>} : memref<128x256xf32, #tpu.memory_space<vmem>>, vector<128x256xf32>,
    } else {
    }
    %c0 = arith.constant 0 : index
    %c0_1 = arith.constant 0 : index
    %3 = vector.load %arg7[%c0, %c0_1] : memref<128x256xf32, #tpu.memory_space<vmem>>, vector<128x256xf32>
    %c0_2 = arith.constant 0 : index
    %c0_3 = arith.constant 0 : index
    %4 = vector.load %arg2[%c0_2, %c0_3] : memref<128x1920xbf16, #tpu.memory_space<vmem>>, vector<128x1920xbf16>
    %c0_4 = arith.constant 0 : index
    %c0_5 = arith.constant 0 : index
    %5 = vector.load %arg3[%c0_4, %c0_5] : memref<1920x256xbf16, #tpu.memory_space<vmem>>, vector<1920x256xbf16>
    %cst = arith.constant dense<0.000000e+00> : vector<128x256xf32>
    %6 = tpu.matmul %4, %5, %cst {dimension_numbers = #tpu.dot_dimension_numbers<[1], [0], [0], [1], [0, 0, 1, 1], [], []>} : vector<128x1920xbf16>, vector<1920x256xbf16>, vector<128x256xf32> -> vector<128x256xf32>
    %7 = arith.addf %3, %6 : vector<128x256xf32>
    %c0_6 = arith.constant 0 : index
    %c0_7 = arith.constant 0 : index
    %8 = vector.load %arg7[%c0_6, %c0_7] : memref<128x256xf32, #tpu.memory_space<vmem>>, vector<128x256xf32>
    tpu.vector_store %arg7[%c0_6, %c0_7], %7 {strides = array<i32>} : memref<128x256xf32, #tpu.memory_space<vmem>>, vector<128x256xf32>,
    %c10_i32 = arith.constant 10 : i32
    %9 = arith.cmpi eq, %arg1, %c10_i32 : i32
    %10 = arith.extui %9 : i1 to i32
    %c0_i32_8 = arith.constant 0 : i32
    %11 = arith.cmpi ne, %10, %c0_i32_8 : i32
    scf.if %11 {
      %c0_9 = arith.constant 0 : index
      %c0_10 = arith.constant 0 : index
      %12 = vector.load %arg7[%c0_9, %c0_10] : memref<128x256xf32, #tpu.memory_space<vmem>>, vector<128x256xf32>
      %c0_11 = arith.constant 0 : index
      %c0_12 = arith.constant 0 : index
      %13 = vector.load %arg4[%c0_11, %c0_12] : memref<1x256xf32, #tpu.memory_space<vmem>>, vector<1x256xf32>
      %14 = vector.broadcast %13 : vector<1x256xf32> to vector<128x256xf32>
      %15 = arith.mulf %12, %14 : vector<128x256xf32>
      %c0_13 = arith.constant 0 : index
      %c0_14 = arith.constant 0 : index
      %16 = vector.load %arg5[%c0_13, %c0_14] : memref<1x256xf32, #tpu.memory_space<vmem>>, vector<1x256xf32>
      %17 = vector.broadcast %16 : vector<1x256xf32> to vector<128x256xf32>
      %18 = arith.addf %15, %17 : vector<128x256xf32>
      %cst_15 = arith.constant 0.000000e+00 : f32
      %19 = vector.broadcast %cst_15 : f32 to vector<128x256xf32>
      %20 = arith.maximumf %18, %19 : vector<128x256xf32>
      %21 = arith.truncf %20 : vector<128x256xf32> to vector<128x256xbf16>
      %c0_16 = arith.constant 0 : index
      %c0_17 = arith.constant 0 : index
      %22 = vector.load %arg6[%c0_16, %c0_17] : memref<128x256xbf16, #tpu.memory_space<vmem>>, vector<128x256xbf16>
      tpu.vector_store %arg6[%c0_16, %c0_17], %21 {strides = array<i32>} : memref<128x256xbf16, #tpu.memory_space<vmem>>, vector<128x256xbf16>,
    } else {
    }
    return
  }
  func.func @transform_0(%arg0: i32, %arg1: i32) -> (i32, i32) {
    %c0_i32 = arith.constant 0 : i32
    return %arg0, %arg1 : i32, i32
  }
  func.func @transform_1(%arg0: i32, %arg1: i32) -> (i32, i32) {
    %c0_i32 = arith.constant 0 : i32
    %c0_i32_0 = arith.constant 0 : i32
    return %arg1, %c0_i32 : i32, i32
  }
  func.func @transform_2(%arg0: i32, %arg1: i32) -> (i32, i32) {
    %c0_i32 = arith.constant 0 : i32
    %c0_i32_0 = arith.constant 0 : i32
    %c0_i32_1 = arith.constant 0 : i32
    return %c0_i32, %c0_i32_0 : i32, i32
  }
  func.func @transform_3(%arg0: i32, %arg1: i32) -> (i32, i32) {
    %c0_i32 = arith.constant 0 : i32
    %c0_i32_0 = arith.constant 0 : i32
    %c0_i32_1 = arith.constant 0 : i32
    return %c0_i32, %c0_i32_0 : i32, i32
  }
  func.func @transform_4(%arg0: i32, %arg1: i32) -> (i32, i32) {
    %c0_i32 = arith.constant 0 : i32
    %c0_i32_0 = arith.constant 0 : i32
    return %arg0, %c0_i32 : i32, i32
  }
}

module attributes {stable_mosaic.version = 11 : i64} {
  func.func @kernel(%arg0: i32, %arg1: i32, %arg2: memref<128x1792xbf16, #tpu.memory_space<vmem>>, %arg3: memref<1792x256xbf16, #tpu.memory_space<vmem>>, %arg4: memref<1x256xf32, #tpu.memory_space<vmem>>, %arg5: memref<1x256xf32, #tpu.memory_space<vmem>>, %arg6: memref<128x256xbf16, #tpu.memory_space<vmem>>, %arg7: memref<128x256xf32, #tpu.memory_space<vmem>>) attributes {dimension_semantics = [#tpu.dimension_semantics<parallel>, #tpu.dimension_semantics<arbitrary>], iteration_bounds = array<i64: 1, 4>, scalar_prefetch = 0 : i64, scratch_operands = 1 : i64, tpu.core_type = #tpu.core_type<tc>, window_params = [{transform_indices = @transform_0, window_bounds = array<i64: 128, 1792>}, {transform_indices = @transform_1, window_bounds = array<i64: 1792, 256>}, {pipeline_mode = #tpu.pipeline_mode<synchronous>, transform_indices = @transform_2, window_bounds = array<i64: 1, 256>}, {pipeline_mode = #tpu.pipeline_mode<synchronous>, transform_indices = @transform_3, window_bounds = array<i64: 1, 256>}, {transform_indices = @transform_4, window_bounds = array<i64: 128, 256>}]} {
    %c0_i32 = arith.constant 0 : i32
    %0 = arith.cmpi eq, %arg1, %c0_i32 : i32
    %1 = arith.extui %0 : i1 to i32
    %c0_i32_0 = arith.constant 0 : i32
    %2 = arith.cmpi ne, %1, %c0_i32_0 : i32
    scf.if %2 {
      %cst_9 = arith.constant 0.000000e+00 : f32
      %12 = vector.broadcast %cst_9 : f32 to vector<128x256xf32>
      %c0_10 = arith.constant 0 : index
      %c0_11 = arith.constant 0 : index
      %13 = vector.load %arg7[%c0_10, %c0_11] : memref<128x256xf32, #tpu.memory_space<vmem>>, vector<128x256xf32>
      tpu.vector_store %arg7[%c0_10, %c0_11], %12 {strides = array<i32>} : memref<128x256xf32, #tpu.memory_space<vmem>>, vector<128x256xf32>,
    } else {
    }
    %c0 = arith.constant 0 : index
    %c0_1 = arith.constant 0 : index
    %3 = vector.load %arg7[%c0, %c0_1] : memref<128x256xf32, #tpu.memory_space<vmem>>, vector<128x256xf32>
    %c0_2 = arith.constant 0 : index
    %c0_3 = arith.constant 0 : index
    %4 = vector.load %arg2[%c0_2, %c0_3] : memref<128x1792xbf16, #tpu.memory_space<vmem>>, vector<128x1792xbf16>
    %c0_4 = arith.constant 0 : index
    %c0_5 = arith.constant 0 : index
    %5 = vector.load %arg3[%c0_4, %c0_5] : memref<1792x256xbf16, #tpu.memory_space<vmem>>, vector<1792x256xbf16>
    %cst = arith.constant dense<0.000000e+00> : vector<128x256xf32>
    %6 = tpu.matmul %4, %5, %cst {dimension_numbers = #tpu.dot_dimension_numbers<[1], [0], [0], [1], [0, 0, 1, 1], [], []>} : vector<128x1792xbf16>, vector<1792x256xbf16>, vector<128x256xf32> -> vector<128x256xf32>
    %7 = arith.addf %3, %6 : vector<128x256xf32>
    %c0_6 = arith.constant 0 : index
    %c0_7 = arith.constant 0 : index
    %8 = vector.load %arg7[%c0_6, %c0_7] : memref<128x256xf32, #tpu.memory_space<vmem>>, vector<128x256xf32>
    tpu.vector_store %arg7[%c0_6, %c0_7], %7 {strides = array<i32>} : memref<128x256xf32, #tpu.memory_space<vmem>>, vector<128x256xf32>,
    %c3_i32 = arith.constant 3 : i32
    %9 = arith.cmpi eq, %arg1, %c3_i32 : i32
    %10 = arith.extui %9 : i1 to i32
    %c0_i32_8 = arith.constant 0 : i32
    %11 = arith.cmpi ne, %10, %c0_i32_8 : i32
    scf.if %11 {
      %c0_9 = arith.constant 0 : index
      %c0_10 = arith.constant 0 : index
      %12 = vector.load %arg7[%c0_9, %c0_10] : memref<128x256xf32, #tpu.memory_space<vmem>>, vector<128x256xf32>
      %c0_11 = arith.constant 0 : index
      %c0_12 = arith.constant 0 : index
      %13 = vector.load %arg4[%c0_11, %c0_12] : memref<1x256xf32, #tpu.memory_space<vmem>>, vector<1x256xf32>
      %14 = vector.broadcast %13 : vector<1x256xf32> to vector<128x256xf32>
      %15 = arith.mulf %12, %14 : vector<128x256xf32>
      %c0_13 = arith.constant 0 : index
      %c0_14 = arith.constant 0 : index
      %16 = vector.load %arg5[%c0_13, %c0_14] : memref<1x256xf32, #tpu.memory_space<vmem>>, vector<1x256xf32>
      %17 = vector.broadcast %16 : vector<1x256xf32> to vector<128x256xf32>
      %18 = arith.addf %15, %17 : vector<128x256xf32>
      %cst_15 = arith.constant 0.000000e+00 : f32
      %19 = vector.broadcast %cst_15 : f32 to vector<128x256xf32>
      %20 = arith.maximumf %18, %19 : vector<128x256xf32>
      %21 = arith.truncf %20 : vector<128x256xf32> to vector<128x256xbf16>
      %c0_16 = arith.constant 0 : index
      %c0_17 = arith.constant 0 : index
      %22 = vector.load %arg6[%c0_16, %c0_17] : memref<128x256xbf16, #tpu.memory_space<vmem>>, vector<128x256xbf16>
      tpu.vector_store %arg6[%c0_16, %c0_17], %21 {strides = array<i32>} : memref<128x256xbf16, #tpu.memory_space<vmem>>, vector<128x256xbf16>,
    } else {
    }
    return
  }
  func.func @transform_0(%arg0: i32, %arg1: i32) -> (i32, i32) {
    %c0_i32 = arith.constant 0 : i32
    return %arg0, %arg1 : i32, i32
  }
  func.func @transform_1(%arg0: i32, %arg1: i32) -> (i32, i32) {
    %c0_i32 = arith.constant 0 : i32
    %c0_i32_0 = arith.constant 0 : i32
    return %arg1, %c0_i32 : i32, i32
  }
  func.func @transform_2(%arg0: i32, %arg1: i32) -> (i32, i32) {
    %c0_i32 = arith.constant 0 : i32
    %c0_i32_0 = arith.constant 0 : i32
    %c0_i32_1 = arith.constant 0 : i32
    return %c0_i32, %c0_i32_0 : i32, i32
  }
  func.func @transform_3(%arg0: i32, %arg1: i32) -> (i32, i32) {
    %c0_i32 = arith.constant 0 : i32
    %c0_i32_0 = arith.constant 0 : i32
    %c0_i32_1 = arith.constant 0 : i32
    return %c0_i32, %c0_i32_0 : i32, i32
  }
  func.func @transform_4(%arg0: i32, %arg1: i32) -> (i32, i32) {
    %c0_i32 = arith.constant 0 : i32
    %c0_i32_0 = arith.constant 0 : i32
    return %arg0, %c0_i32 : i32, i32
  }
}

module attributes {stable_mosaic.version = 11 : i64} {
  func.func @kernel(%arg0: i32, %arg1: i32, %arg2: memref<128x256xbf16, #tpu.memory_space<vmem>>, %arg3: memref<256x2048xbf16, #tpu.memory_space<vmem>>, %arg4: memref<1x2048xf32, #tpu.memory_space<vmem>>, %arg5: memref<128x2048xbf16, #tpu.memory_space<vmem>>, %arg6: memref<128x2048xf32, #tpu.memory_space<vmem>>) attributes {dimension_semantics = [#tpu.dimension_semantics<parallel>, #tpu.dimension_semantics<arbitrary>], iteration_bounds = array<i64: 1, 1>, scalar_prefetch = 0 : i64, scratch_operands = 1 : i64, tpu.core_type = #tpu.core_type<tc>, window_params = [{transform_indices = @transform_0, window_bounds = array<i64: 128, 256>}, {transform_indices = @transform_1, window_bounds = array<i64: 256, 2048>}, {pipeline_mode = #tpu.pipeline_mode<synchronous>, transform_indices = @transform_2, window_bounds = array<i64: 1, 2048>}, {transform_indices = @transform_3, window_bounds = array<i64: 128, 2048>}]} {
    %c0_i32 = arith.constant 0 : i32
    %0 = arith.cmpi eq, %arg1, %c0_i32 : i32
    %1 = arith.extui %0 : i1 to i32
    %c0_i32_0 = arith.constant 0 : i32
    %2 = arith.cmpi ne, %1, %c0_i32_0 : i32
    scf.if %2 {
      %cst_10 = arith.constant 0.000000e+00 : f32
      %12 = vector.broadcast %cst_10 : f32 to vector<128x2048xf32>
      %c0_11 = arith.constant 0 : index
      %c0_12 = arith.constant 0 : index
      %13 = vector.load %arg6[%c0_11, %c0_12] : memref<128x2048xf32, #tpu.memory_space<vmem>>, vector<128x2048xf32>
      tpu.vector_store %arg6[%c0_11, %c0_12], %12 {strides = array<i32>} : memref<128x2048xf32, #tpu.memory_space<vmem>>, vector<128x2048xf32>,
    } else {
    }
    %c0 = arith.constant 0 : index
    %c0_1 = arith.constant 0 : index
    %3 = vector.load %arg6[%c0, %c0_1] : memref<128x2048xf32, #tpu.memory_space<vmem>>, vector<128x2048xf32>
    %c0_2 = arith.constant 0 : index
    %c0_3 = arith.constant 0 : index
    %4 = vector.load %arg2[%c0_2, %c0_3] : memref<128x256xbf16, #tpu.memory_space<vmem>>, vector<128x256xbf16>
    %c0_4 = arith.constant 0 : index
    %c0_5 = arith.constant 0 : index
    %5 = vector.load %arg3[%c0_4, %c0_5] : memref<256x2048xbf16, #tpu.memory_space<vmem>>, vector<256x2048xbf16>
    %cst = arith.constant dense<0.000000e+00> : vector<128x2048xf32>
    %6 = tpu.matmul %4, %5, %cst {dimension_numbers = #tpu.dot_dimension_numbers<[1], [0], [0], [1], [0, 0, 1, 1], [], []>} : vector<128x256xbf16>, vector<256x2048xbf16>, vector<128x2048xf32> -> vector<128x2048xf32>
    %7 = arith.addf %3, %6 : vector<128x2048xf32>
    %c0_6 = arith.constant 0 : index
    %c0_7 = arith.constant 0 : index
    %8 = vector.load %arg6[%c0_6, %c0_7] : memref<128x2048xf32, #tpu.memory_space<vmem>>, vector<128x2048xf32>
    tpu.vector_store %arg6[%c0_6, %c0_7], %7 {strides = array<i32>} : memref<128x2048xf32, #tpu.memory_space<vmem>>, vector<128x2048xf32>,
    %c0_i32_8 = arith.constant 0 : i32
    %9 = arith.cmpi eq, %arg1, %c0_i32_8 : i32
    %10 = arith.extui %9 : i1 to i32
    %c0_i32_9 = arith.constant 0 : i32
    %11 = arith.cmpi ne, %10, %c0_i32_9 : i32
    scf.if %11 {
      %c0_10 = arith.constant 0 : index
      %c0_11 = arith.constant 0 : index
      %12 = vector.load %arg6[%c0_10, %c0_11] : memref<128x2048xf32, #tpu.memory_space<vmem>>, vector<128x2048xf32>
      %c0_12 = arith.constant 0 : index
      %c0_13 = arith.constant 0 : index
      %13 = vector.load %arg4[%c0_12, %c0_13] : memref<1x2048xf32, #tpu.memory_space<vmem>>, vector<1x2048xf32>
      %14 = vector.broadcast %13 : vector<1x2048xf32> to vector<128x2048xf32>
      %15 = arith.addf %12, %14 : vector<128x2048xf32>
      %16 = arith.truncf %15 : vector<128x2048xf32> to vector<128x2048xbf16>
      %c0_14 = arith.constant 0 : index
      %c0_15 = arith.constant 0 : index
      %17 = vector.load %arg5[%c0_14, %c0_15] : memref<128x2048xbf16, #tpu.memory_space<vmem>>, vector<128x2048xbf16>
      tpu.vector_store %arg5[%c0_14, %c0_15], %16 {strides = array<i32>} : memref<128x2048xbf16, #tpu.memory_space<vmem>>, vector<128x2048xbf16>,
    } else {
    }
    return
  }
  func.func @transform_0(%arg0: i32, %arg1: i32) -> (i32, i32) {
    %c0_i32 = arith.constant 0 : i32
    return %arg0, %arg1 : i32, i32
  }
  func.func @transform_1(%arg0: i32, %arg1: i32) -> (i32, i32) {
    %c0_i32 = arith.constant 0 : i32
    %c0_i32_0 = arith.constant 0 : i32
    return %arg1, %c0_i32 : i32, i32
  }
  func.func @transform_2(%arg0: i32, %arg1: i32) -> (i32, i32) {
    %c0_i32 = arith.constant 0 : i32
    %c0_i32_0 = arith.constant 0 : i32
    %c0_i32_1 = arith.constant 0 : i32
    return %c0_i32, %c0_i32_0 : i32, i32
  }
  func.func @transform_3(%arg0: i32, %arg1: i32) -> (i32, i32) {
    %c0_i32 = arith.constant 0 : i32
    %c0_i32_0 = arith.constant 0 : i32
    return %arg0, %c0_i32 : i32, i32
  }
}

module attributes {stable_mosaic.version = 11 : i64} {
  func.func @kernel(%arg0: i32, %arg1: i32, %arg2: memref<512x1792xbf16, #tpu.memory_space<vmem>>, %arg3: memref<1792x128xbf16, #tpu.memory_space<vmem>>, %arg4: memref<1x128xf32, #tpu.memory_space<vmem>>, %arg5: memref<1x128xf32, #tpu.memory_space<vmem>>, %arg6: memref<512x128xbf16, #tpu.memory_space<vmem>>, %arg7: memref<512x128xf32, #tpu.memory_space<vmem>>) attributes {dimension_semantics = [#tpu.dimension_semantics<parallel>, #tpu.dimension_semantics<arbitrary>], iteration_bounds = array<i64: 2, 6>, scalar_prefetch = 0 : i64, scratch_operands = 1 : i64, tpu.core_type = #tpu.core_type<tc>, window_params = [{transform_indices = @transform_0, window_bounds = array<i64: 512, 1792>}, {transform_indices = @transform_1, window_bounds = array<i64: 1792, 128>}, {pipeline_mode = #tpu.pipeline_mode<synchronous>, transform_indices = @transform_2, window_bounds = array<i64: 1, 128>}, {pipeline_mode = #tpu.pipeline_mode<synchronous>, transform_indices = @transform_3, window_bounds = array<i64: 1, 128>}, {transform_indices = @transform_4, window_bounds = array<i64: 512, 128>}]} {
    %c0_i32 = arith.constant 0 : i32
    %0 = arith.cmpi eq, %arg1, %c0_i32 : i32
    %1 = arith.extui %0 : i1 to i32
    %c0_i32_0 = arith.constant 0 : i32
    %2 = arith.cmpi ne, %1, %c0_i32_0 : i32
    scf.if %2 {
      %cst_9 = arith.constant 0.000000e+00 : f32
      %12 = vector.broadcast %cst_9 : f32 to vector<512x128xf32>
      %c0_10 = arith.constant 0 : index
      %c0_11 = arith.constant 0 : index
      %13 = vector.load %arg7[%c0_10, %c0_11] : memref<512x128xf32, #tpu.memory_space<vmem>>, vector<512x128xf32>
      tpu.vector_store %arg7[%c0_10, %c0_11], %12 {strides = array<i32>} : memref<512x128xf32, #tpu.memory_space<vmem>>, vector<512x128xf32>,
    } else {
    }
    %c0 = arith.constant 0 : index
    %c0_1 = arith.constant 0 : index
    %3 = vector.load %arg7[%c0, %c0_1] : memref<512x128xf32, #tpu.memory_space<vmem>>, vector<512x128xf32>
    %c0_2 = arith.constant 0 : index
    %c0_3 = arith.constant 0 : index
    %4 = vector.load %arg2[%c0_2, %c0_3] : memref<512x1792xbf16, #tpu.memory_space<vmem>>, vector<512x1792xbf16>
    %c0_4 = arith.constant 0 : index
    %c0_5 = arith.constant 0 : index
    %5 = vector.load %arg3[%c0_4, %c0_5] : memref<1792x128xbf16, #tpu.memory_space<vmem>>, vector<1792x128xbf16>
    %cst = arith.constant dense<0.000000e+00> : vector<512x128xf32>
    %6 = tpu.matmul %4, %5, %cst {dimension_numbers = #tpu.dot_dimension_numbers<[1], [0], [0], [1], [0, 0, 1, 1], [], []>} : vector<512x1792xbf16>, vector<1792x128xbf16>, vector<512x128xf32> -> vector<512x128xf32>
    %7 = arith.addf %3, %6 : vector<512x128xf32>
    %c0_6 = arith.constant 0 : index
    %c0_7 = arith.constant 0 : index
    %8 = vector.load %arg7[%c0_6, %c0_7] : memref<512x128xf32, #tpu.memory_space<vmem>>, vector<512x128xf32>
    tpu.vector_store %arg7[%c0_6, %c0_7], %7 {strides = array<i32>} : memref<512x128xf32, #tpu.memory_space<vmem>>, vector<512x128xf32>,
    %c5_i32 = arith.constant 5 : i32
    %9 = arith.cmpi eq, %arg1, %c5_i32 : i32
    %10 = arith.extui %9 : i1 to i32
    %c0_i32_8 = arith.constant 0 : i32
    %11 = arith.cmpi ne, %10, %c0_i32_8 : i32
    scf.if %11 {
      %c0_9 = arith.constant 0 : index
      %c0_10 = arith.constant 0 : index
      %12 = vector.load %arg7[%c0_9, %c0_10] : memref<512x128xf32, #tpu.memory_space<vmem>>, vector<512x128xf32>
      %c0_11 = arith.constant 0 : index
      %c0_12 = arith.constant 0 : index
      %13 = vector.load %arg4[%c0_11, %c0_12] : memref<1x128xf32, #tpu.memory_space<vmem>>, vector<1x128xf32>
      %14 = vector.broadcast %13 : vector<1x128xf32> to vector<512x128xf32>
      %15 = arith.mulf %12, %14 : vector<512x128xf32>
      %c0_13 = arith.constant 0 : index
      %c0_14 = arith.constant 0 : index
      %16 = vector.load %arg5[%c0_13, %c0_14] : memref<1x128xf32, #tpu.memory_space<vmem>>, vector<1x128xf32>
      %17 = vector.broadcast %16 : vector<1x128xf32> to vector<512x128xf32>
      %18 = arith.addf %15, %17 : vector<512x128xf32>
      %cst_15 = arith.constant 0.000000e+00 : f32
      %19 = vector.broadcast %cst_15 : f32 to vector<512x128xf32>
      %20 = arith.maximumf %18, %19 : vector<512x128xf32>
      %21 = arith.truncf %20 : vector<512x128xf32> to vector<512x128xbf16>
      %c0_16 = arith.constant 0 : index
      %c0_17 = arith.constant 0 : index
      %22 = vector.load %arg6[%c0_16, %c0_17] : memref<512x128xbf16, #tpu.memory_space<vmem>>, vector<512x128xbf16>
      tpu.vector_store %arg6[%c0_16, %c0_17], %21 {strides = array<i32>} : memref<512x128xbf16, #tpu.memory_space<vmem>>, vector<512x128xbf16>,
    } else {
    }
    return
  }
  func.func @transform_0(%arg0: i32, %arg1: i32) -> (i32, i32) {
    %c0_i32 = arith.constant 0 : i32
    return %arg0, %arg1 : i32, i32
  }
  func.func @transform_1(%arg0: i32, %arg1: i32) -> (i32, i32) {
    %c0_i32 = arith.constant 0 : i32
    %c0_i32_0 = arith.constant 0 : i32
    return %arg1, %c0_i32 : i32, i32
  }
  func.func @transform_2(%arg0: i32, %arg1: i32) -> (i32, i32) {
    %c0_i32 = arith.constant 0 : i32
    %c0_i32_0 = arith.constant 0 : i32
    %c0_i32_1 = arith.constant 0 : i32
    return %c0_i32, %c0_i32_0 : i32, i32
  }
  func.func @transform_3(%arg0: i32, %arg1: i32) -> (i32, i32) {
    %c0_i32 = arith.constant 0 : i32
    %c0_i32_0 = arith.constant 0 : i32
    %c0_i32_1 = arith.constant 0 : i32
    return %c0_i32, %c0_i32_0 : i32, i32
  }
  func.func @transform_4(%arg0: i32, %arg1: i32) -> (i32, i32) {
    %c0_i32 = arith.constant 0 : i32
    %c0_i32_0 = arith.constant 0 : i32
    return %arg0, %c0_i32 : i32, i32
  }
}

module attributes {stable_mosaic.version = 11 : i64} {
  func.func @kernel(%arg0: i32, %arg1: i32, %arg2: memref<512x1792xbf16, #tpu.memory_space<vmem>>, %arg3: memref<1792x128xbf16, #tpu.memory_space<vmem>>, %arg4: memref<1x128xf32, #tpu.memory_space<vmem>>, %arg5: memref<1x128xf32, #tpu.memory_space<vmem>>, %arg6: memref<512x128xbf16, #tpu.memory_space<vmem>>, %arg7: memref<512x128xf32, #tpu.memory_space<vmem>>) attributes {dimension_semantics = [#tpu.dimension_semantics<parallel>, #tpu.dimension_semantics<arbitrary>], iteration_bounds = array<i64: 2, 2>, scalar_prefetch = 0 : i64, scratch_operands = 1 : i64, tpu.core_type = #tpu.core_type<tc>, window_params = [{transform_indices = @transform_0, window_bounds = array<i64: 512, 1792>}, {transform_indices = @transform_1, window_bounds = array<i64: 1792, 128>}, {pipeline_mode = #tpu.pipeline_mode<synchronous>, transform_indices = @transform_2, window_bounds = array<i64: 1, 128>}, {pipeline_mode = #tpu.pipeline_mode<synchronous>, transform_indices = @transform_3, window_bounds = array<i64: 1, 128>}, {transform_indices = @transform_4, window_bounds = array<i64: 512, 128>}]} {
    %c0_i32 = arith.constant 0 : i32
    %0 = arith.cmpi eq, %arg1, %c0_i32 : i32
    %1 = arith.extui %0 : i1 to i32
    %c0_i32_0 = arith.constant 0 : i32
    %2 = arith.cmpi ne, %1, %c0_i32_0 : i32
    scf.if %2 {
      %cst_9 = arith.constant 0.000000e+00 : f32
      %12 = vector.broadcast %cst_9 : f32 to vector<512x128xf32>
      %c0_10 = arith.constant 0 : index
      %c0_11 = arith.constant 0 : index
      %13 = vector.load %arg7[%c0_10, %c0_11] : memref<512x128xf32, #tpu.memory_space<vmem>>, vector<512x128xf32>
      tpu.vector_store %arg7[%c0_10, %c0_11], %12 {strides = array<i32>} : memref<512x128xf32, #tpu.memory_space<vmem>>, vector<512x128xf32>,
    } else {
    }
    %c0 = arith.constant 0 : index
    %c0_1 = arith.constant 0 : index
    %3 = vector.load %arg7[%c0, %c0_1] : memref<512x128xf32, #tpu.memory_space<vmem>>, vector<512x128xf32>
    %c0_2 = arith.constant 0 : index
    %c0_3 = arith.constant 0 : index
    %4 = vector.load %arg2[%c0_2, %c0_3] : memref<512x1792xbf16, #tpu.memory_space<vmem>>, vector<512x1792xbf16>
    %c0_4 = arith.constant 0 : index
    %c0_5 = arith.constant 0 : index
    %5 = vector.load %arg3[%c0_4, %c0_5] : memref<1792x128xbf16, #tpu.memory_space<vmem>>, vector<1792x128xbf16>
    %cst = arith.constant dense<0.000000e+00> : vector<512x128xf32>
    %6 = tpu.matmul %4, %5, %cst {dimension_numbers = #tpu.dot_dimension_numbers<[1], [0], [0], [1], [0, 0, 1, 1], [], []>} : vector<512x1792xbf16>, vector<1792x128xbf16>, vector<512x128xf32> -> vector<512x128xf32>
    %7 = arith.addf %3, %6 : vector<512x128xf32>
    %c0_6 = arith.constant 0 : index
    %c0_7 = arith.constant 0 : index
    %8 = vector.load %arg7[%c0_6, %c0_7] : memref<512x128xf32, #tpu.memory_space<vmem>>, vector<512x128xf32>
    tpu.vector_store %arg7[%c0_6, %c0_7], %7 {strides = array<i32>} : memref<512x128xf32, #tpu.memory_space<vmem>>, vector<512x128xf32>,
    %c1_i32 = arith.constant 1 : i32
    %9 = arith.cmpi eq, %arg1, %c1_i32 : i32
    %10 = arith.extui %9 : i1 to i32
    %c0_i32_8 = arith.constant 0 : i32
    %11 = arith.cmpi ne, %10, %c0_i32_8 : i32
    scf.if %11 {
      %c0_9 = arith.constant 0 : index
      %c0_10 = arith.constant 0 : index
      %12 = vector.load %arg7[%c0_9, %c0_10] : memref<512x128xf32, #tpu.memory_space<vmem>>, vector<512x128xf32>
      %c0_11 = arith.constant 0 : index
      %c0_12 = arith.constant 0 : index
      %13 = vector.load %arg4[%c0_11, %c0_12] : memref<1x128xf32, #tpu.memory_space<vmem>>, vector<1x128xf32>
      %14 = vector.broadcast %13 : vector<1x128xf32> to vector<512x128xf32>
      %15 = arith.mulf %12, %14 : vector<512x128xf32>
      %c0_13 = arith.constant 0 : index
      %c0_14 = arith.constant 0 : index
      %16 = vector.load %arg5[%c0_13, %c0_14] : memref<1x128xf32, #tpu.memory_space<vmem>>, vector<1x128xf32>
      %17 = vector.broadcast %16 : vector<1x128xf32> to vector<512x128xf32>
      %18 = arith.addf %15, %17 : vector<512x128xf32>
      %cst_15 = arith.constant 0.000000e+00 : f32
      %19 = vector.broadcast %cst_15 : f32 to vector<512x128xf32>
      %20 = arith.maximumf %18, %19 : vector<512x128xf32>
      %21 = arith.truncf %20 : vector<512x128xf32> to vector<512x128xbf16>
      %c0_16 = arith.constant 0 : index
      %c0_17 = arith.constant 0 : index
      %22 = vector.load %arg6[%c0_16, %c0_17] : memref<512x128xbf16, #tpu.memory_space<vmem>>, vector<512x128xbf16>
      tpu.vector_store %arg6[%c0_16, %c0_17], %21 {strides = array<i32>} : memref<512x128xbf16, #tpu.memory_space<vmem>>, vector<512x128xbf16>,
    } else {
    }
    return
  }
  func.func @transform_0(%arg0: i32, %arg1: i32) -> (i32, i32) {
    %c0_i32 = arith.constant 0 : i32
    return %arg0, %arg1 : i32, i32
  }
  func.func @transform_1(%arg0: i32, %arg1: i32) -> (i32, i32) {
    %c0_i32 = arith.constant 0 : i32
    %c0_i32_0 = arith.constant 0 : i32
    return %arg1, %c0_i32 : i32, i32
  }
  func.func @transform_2(%arg0: i32, %arg1: i32) -> (i32, i32) {
    %c0_i32 = arith.constant 0 : i32
    %c0_i32_0 = arith.constant 0 : i32
    %c0_i32_1 = arith.constant 0 : i32
    return %c0_i32, %c0_i32_0 : i32, i32
  }
  func.func @transform_3(%arg0: i32, %arg1: i32) -> (i32, i32) {
    %c0_i32 = arith.constant 0 : i32
    %c0_i32_0 = arith.constant 0 : i32
    %c0_i32_1 = arith.constant 0 : i32
    return %c0_i32, %c0_i32_0 : i32, i32
  }
  func.func @transform_4(%arg0: i32, %arg1: i32) -> (i32, i32) {
    %c0_i32 = arith.constant 0 : i32
    %c0_i32_0 = arith.constant 0 : i32
    return %arg0, %c0_i32 : i32, i32
  }
}

module attributes {stable_mosaic.version = 11 : i64} {
  func.func @kernel(%arg0: i32, %arg1: i32, %arg2: memref<512x128xbf16, #tpu.memory_space<vmem>>, %arg3: memref<128x1024xbf16, #tpu.memory_space<vmem>>, %arg4: memref<1x1024xf32, #tpu.memory_space<vmem>>, %arg5: memref<512x1024xbf16, #tpu.memory_space<vmem>>, %arg6: memref<512x1024xf32, #tpu.memory_space<vmem>>) attributes {dimension_semantics = [#tpu.dimension_semantics<parallel>, #tpu.dimension_semantics<arbitrary>], iteration_bounds = array<i64: 2, 1>, scalar_prefetch = 0 : i64, scratch_operands = 1 : i64, tpu.core_type = #tpu.core_type<tc>, window_params = [{transform_indices = @transform_0, window_bounds = array<i64: 512, 128>}, {transform_indices = @transform_1, window_bounds = array<i64: 128, 1024>}, {pipeline_mode = #tpu.pipeline_mode<synchronous>, transform_indices = @transform_2, window_bounds = array<i64: 1, 1024>}, {transform_indices = @transform_3, window_bounds = array<i64: 512, 1024>}]} {
    %c0_i32 = arith.constant 0 : i32
    %0 = arith.cmpi eq, %arg1, %c0_i32 : i32
    %1 = arith.extui %0 : i1 to i32
    %c0_i32_0 = arith.constant 0 : i32
    %2 = arith.cmpi ne, %1, %c0_i32_0 : i32
    scf.if %2 {
      %cst_10 = arith.constant 0.000000e+00 : f32
      %12 = vector.broadcast %cst_10 : f32 to vector<512x1024xf32>
      %c0_11 = arith.constant 0 : index
      %c0_12 = arith.constant 0 : index
      %13 = vector.load %arg6[%c0_11, %c0_12] : memref<512x1024xf32, #tpu.memory_space<vmem>>, vector<512x1024xf32>
      tpu.vector_store %arg6[%c0_11, %c0_12], %12 {strides = array<i32>} : memref<512x1024xf32, #tpu.memory_space<vmem>>, vector<512x1024xf32>,
    } else {
    }
    %c0 = arith.constant 0 : index
    %c0_1 = arith.constant 0 : index
    %3 = vector.load %arg6[%c0, %c0_1] : memref<512x1024xf32, #tpu.memory_space<vmem>>, vector<512x1024xf32>
    %c0_2 = arith.constant 0 : index
    %c0_3 = arith.constant 0 : index
    %4 = vector.load %arg2[%c0_2, %c0_3] : memref<512x128xbf16, #tpu.memory_space<vmem>>, vector<512x128xbf16>
    %c0_4 = arith.constant 0 : index
    %c0_5 = arith.constant 0 : index
    %5 = vector.load %arg3[%c0_4, %c0_5] : memref<128x1024xbf16, #tpu.memory_space<vmem>>, vector<128x1024xbf16>
    %cst = arith.constant dense<0.000000e+00> : vector<512x1024xf32>
    %6 = tpu.matmul %4, %5, %cst {dimension_numbers = #tpu.dot_dimension_numbers<[1], [0], [0], [1], [0, 0, 1, 1], [], []>} : vector<512x128xbf16>, vector<128x1024xbf16>, vector<512x1024xf32> -> vector<512x1024xf32>
    %7 = arith.addf %3, %6 : vector<512x1024xf32>
    %c0_6 = arith.constant 0 : index
    %c0_7 = arith.constant 0 : index
    %8 = vector.load %arg6[%c0_6, %c0_7] : memref<512x1024xf32, #tpu.memory_space<vmem>>, vector<512x1024xf32>
    tpu.vector_store %arg6[%c0_6, %c0_7], %7 {strides = array<i32>} : memref<512x1024xf32, #tpu.memory_space<vmem>>, vector<512x1024xf32>,
    %c0_i32_8 = arith.constant 0 : i32
    %9 = arith.cmpi eq, %arg1, %c0_i32_8 : i32
    %10 = arith.extui %9 : i1 to i32
    %c0_i32_9 = arith.constant 0 : i32
    %11 = arith.cmpi ne, %10, %c0_i32_9 : i32
    scf.if %11 {
      %c0_10 = arith.constant 0 : index
      %c0_11 = arith.constant 0 : index
      %12 = vector.load %arg6[%c0_10, %c0_11] : memref<512x1024xf32, #tpu.memory_space<vmem>>, vector<512x1024xf32>
      %c0_12 = arith.constant 0 : index
      %c0_13 = arith.constant 0 : index
      %13 = vector.load %arg4[%c0_12, %c0_13] : memref<1x1024xf32, #tpu.memory_space<vmem>>, vector<1x1024xf32>
      %14 = vector.broadcast %13 : vector<1x1024xf32> to vector<512x1024xf32>
      %15 = arith.addf %12, %14 : vector<512x1024xf32>
      %16 = arith.truncf %15 : vector<512x1024xf32> to vector<512x1024xbf16>
      %c0_14 = arith.constant 0 : index
      %c0_15 = arith.constant 0 : index
      %17 = vector.load %arg5[%c0_14, %c0_15] : memref<512x1024xbf16, #tpu.memory_space<vmem>>, vector<512x1024xbf16>
      tpu.vector_store %arg5[%c0_14, %c0_15], %16 {strides = array<i32>} : memref<512x1024xbf16, #tpu.memory_space<vmem>>, vector<512x1024xbf16>,
    } else {
    }
    return
  }
  func.func @transform_0(%arg0: i32, %arg1: i32) -> (i32, i32) {
    %c0_i32 = arith.constant 0 : i32
    return %arg0, %arg1 : i32, i32
  }
  func.func @transform_1(%arg0: i32, %arg1: i32) -> (i32, i32) {
    %c0_i32 = arith.constant 0 : i32
    %c0_i32_0 = arith.constant 0 : i32
    return %arg1, %c0_i32 : i32, i32
  }
  func.func @transform_2(%arg0: i32, %arg1: i32) -> (i32, i32) {
    %c0_i32 = arith.constant 0 : i32
    %c0_i32_0 = arith.constant 0 : i32
    %c0_i32_1 = arith.constant 0 : i32
    return %c0_i32, %c0_i32_0 : i32, i32
  }
  func.func @transform_3(%arg0: i32, %arg1: i32) -> (i32, i32) {
    %c0_i32 = arith.constant 0 : i32
    %c0_i32_0 = arith.constant 0 : i32
    return %arg0, %c0_i32 : i32, i32
  }
}

module attributes {stable_mosaic.version = 11 : i64} {
  func.func @kernel(%arg0: i32, %arg1: i32, %arg2: memref<512x1792xbf16, #tpu.memory_space<vmem>>, %arg3: memref<1792x128xbf16, #tpu.memory_space<vmem>>, %arg4: memref<1x128xf32, #tpu.memory_space<vmem>>, %arg5: memref<1x128xf32, #tpu.memory_space<vmem>>, %arg6: memref<512x128xbf16, #tpu.memory_space<vmem>>, %arg7: memref<512x128xf32, #tpu.memory_space<vmem>>) attributes {dimension_semantics = [#tpu.dimension_semantics<parallel>, #tpu.dimension_semantics<arbitrary>], iteration_bounds = array<i64: 16, 3>, scalar_prefetch = 0 : i64, scratch_operands = 1 : i64, tpu.core_type = #tpu.core_type<tc>, window_params = [{transform_indices = @transform_0, window_bounds = array<i64: 512, 1792>}, {transform_indices = @transform_1, window_bounds = array<i64: 1792, 128>}, {pipeline_mode = #tpu.pipeline_mode<synchronous>, transform_indices = @transform_2, window_bounds = array<i64: 1, 128>}, {pipeline_mode = #tpu.pipeline_mode<synchronous>, transform_indices = @transform_3, window_bounds = array<i64: 1, 128>}, {transform_indices = @transform_4, window_bounds = array<i64: 512, 128>}]} {
    %c0_i32 = arith.constant 0 : i32
    %0 = arith.cmpi eq, %arg1, %c0_i32 : i32
    %1 = arith.extui %0 : i1 to i32
    %c0_i32_0 = arith.constant 0 : i32
    %2 = arith.cmpi ne, %1, %c0_i32_0 : i32
    scf.if %2 {
      %cst_9 = arith.constant 0.000000e+00 : f32
      %12 = vector.broadcast %cst_9 : f32 to vector<512x128xf32>
      %c0_10 = arith.constant 0 : index
      %c0_11 = arith.constant 0 : index
      %13 = vector.load %arg7[%c0_10, %c0_11] : memref<512x128xf32, #tpu.memory_space<vmem>>, vector<512x128xf32>
      tpu.vector_store %arg7[%c0_10, %c0_11], %12 {strides = array<i32>} : memref<512x128xf32, #tpu.memory_space<vmem>>, vector<512x128xf32>,
    } else {
    }
    %c0 = arith.constant 0 : index
    %c0_1 = arith.constant 0 : index
    %3 = vector.load %arg7[%c0, %c0_1] : memref<512x128xf32, #tpu.memory_space<vmem>>, vector<512x128xf32>
    %c0_2 = arith.constant 0 : index
    %c0_3 = arith.constant 0 : index
    %4 = vector.load %arg2[%c0_2, %c0_3] : memref<512x1792xbf16, #tpu.memory_space<vmem>>, vector<512x1792xbf16>
    %c0_4 = arith.constant 0 : index
    %c0_5 = arith.constant 0 : index
    %5 = vector.load %arg3[%c0_4, %c0_5] : memref<1792x128xbf16, #tpu.memory_space<vmem>>, vector<1792x128xbf16>
    %cst = arith.constant dense<0.000000e+00> : vector<512x128xf32>
    %6 = tpu.matmul %4, %5, %cst {dimension_numbers = #tpu.dot_dimension_numbers<[1], [0], [0], [1], [0, 0, 1, 1], [], []>} : vector<512x1792xbf16>, vector<1792x128xbf16>, vector<512x128xf32> -> vector<512x128xf32>
    %7 = arith.addf %3, %6 : vector<512x128xf32>
    %c0_6 = arith.constant 0 : index
    %c0_7 = arith.constant 0 : index
    %8 = vector.load %arg7[%c0_6, %c0_7] : memref<512x128xf32, #tpu.memory_space<vmem>>, vector<512x128xf32>
    tpu.vector_store %arg7[%c0_6, %c0_7], %7 {strides = array<i32>} : memref<512x128xf32, #tpu.memory_space<vmem>>, vector<512x128xf32>,
    %c2_i32 = arith.constant 2 : i32
    %9 = arith.cmpi eq, %arg1, %c2_i32 : i32
    %10 = arith.extui %9 : i1 to i32
    %c0_i32_8 = arith.constant 0 : i32
    %11 = arith.cmpi ne, %10, %c0_i32_8 : i32
    scf.if %11 {
      %c0_9 = arith.constant 0 : index
      %c0_10 = arith.constant 0 : index
      %12 = vector.load %arg7[%c0_9, %c0_10] : memref<512x128xf32, #tpu.memory_space<vmem>>, vector<512x128xf32>
      %c0_11 = arith.constant 0 : index
      %c0_12 = arith.constant 0 : index
      %13 = vector.load %arg4[%c0_11, %c0_12] : memref<1x128xf32, #tpu.memory_space<vmem>>, vector<1x128xf32>
      %14 = vector.broadcast %13 : vector<1x128xf32> to vector<512x128xf32>
      %15 = arith.mulf %12, %14 : vector<512x128xf32>
      %c0_13 = arith.constant 0 : index
      %c0_14 = arith.constant 0 : index
      %16 = vector.load %arg5[%c0_13, %c0_14] : memref<1x128xf32, #tpu.memory_space<vmem>>, vector<1x128xf32>
      %17 = vector.broadcast %16 : vector<1x128xf32> to vector<512x128xf32>
      %18 = arith.addf %15, %17 : vector<512x128xf32>
      %cst_15 = arith.constant 0.000000e+00 : f32
      %19 = vector.broadcast %cst_15 : f32 to vector<512x128xf32>
      %20 = arith.maximumf %18, %19 : vector<512x128xf32>
      %21 = arith.truncf %20 : vector<512x128xf32> to vector<512x128xbf16>
      %c0_16 = arith.constant 0 : index
      %c0_17 = arith.constant 0 : index
      %22 = vector.load %arg6[%c0_16, %c0_17] : memref<512x128xbf16, #tpu.memory_space<vmem>>, vector<512x128xbf16>
      tpu.vector_store %arg6[%c0_16, %c0_17], %21 {strides = array<i32>} : memref<512x128xbf16, #tpu.memory_space<vmem>>, vector<512x128xbf16>,
    } else {
    }
    return
  }
  func.func @transform_0(%arg0: i32, %arg1: i32) -> (i32, i32) {
    %c0_i32 = arith.constant 0 : i32
    return %arg0, %arg1 : i32, i32
  }
  func.func @transform_1(%arg0: i32, %arg1: i32) -> (i32, i32) {
    %c0_i32 = arith.constant 0 : i32
    %c0_i32_0 = arith.constant 0 : i32
    return %arg1, %c0_i32 : i32, i32
  }
  func.func @transform_2(%arg0: i32, %arg1: i32) -> (i32, i32) {
    %c0_i32 = arith.constant 0 : i32
    %c0_i32_0 = arith.constant 0 : i32
    %c0_i32_1 = arith.constant 0 : i32
    return %c0_i32, %c0_i32_0 : i32, i32
  }
  func.func @transform_3(%arg0: i32, %arg1: i32) -> (i32, i32) {
    %c0_i32 = arith.constant 0 : i32
    %c0_i32_0 = arith.constant 0 : i32
    %c0_i32_1 = arith.constant 0 : i32
    return %c0_i32, %c0_i32_0 : i32, i32
  }
  func.func @transform_4(%arg0: i32, %arg1: i32) -> (i32, i32) {
    %c0_i32 = arith.constant 0 : i32
    %c0_i32_0 = arith.constant 0 : i32
    return %arg0, %c0_i32 : i32, i32
  }
}

module attributes {stable_mosaic.version = 11 : i64} {
  func.func @kernel(%arg0: i32, %arg1: i32, %arg2: memref<512x1792xbf16, #tpu.memory_space<vmem>>, %arg3: memref<1792x128xbf16, #tpu.memory_space<vmem>>, %arg4: memref<1x128xf32, #tpu.memory_space<vmem>>, %arg5: memref<1x128xf32, #tpu.memory_space<vmem>>, %arg6: memref<512x128xbf16, #tpu.memory_space<vmem>>, %arg7: memref<512x128xf32, #tpu.memory_space<vmem>>) attributes {dimension_semantics = [#tpu.dimension_semantics<parallel>, #tpu.dimension_semantics<arbitrary>], iteration_bounds = array<i64: 16, 1>, scalar_prefetch = 0 : i64, scratch_operands = 1 : i64, tpu.core_type = #tpu.core_type<tc>, window_params = [{transform_indices = @transform_0, window_bounds = array<i64: 512, 1792>}, {transform_indices = @transform_1, window_bounds = array<i64: 1792, 128>}, {pipeline_mode = #tpu.pipeline_mode<synchronous>, transform_indices = @transform_2, window_bounds = array<i64: 1, 128>}, {pipeline_mode = #tpu.pipeline_mode<synchronous>, transform_indices = @transform_3, window_bounds = array<i64: 1, 128>}, {transform_indices = @transform_4, window_bounds = array<i64: 512, 128>}]} {
    %c0_i32 = arith.constant 0 : i32
    %0 = arith.cmpi eq, %arg1, %c0_i32 : i32
    %1 = arith.extui %0 : i1 to i32
    %c0_i32_0 = arith.constant 0 : i32
    %2 = arith.cmpi ne, %1, %c0_i32_0 : i32
    scf.if %2 {
      %cst_10 = arith.constant 0.000000e+00 : f32
      %12 = vector.broadcast %cst_10 : f32 to vector<512x128xf32>
      %c0_11 = arith.constant 0 : index
      %c0_12 = arith.constant 0 : index
      %13 = vector.load %arg7[%c0_11, %c0_12] : memref<512x128xf32, #tpu.memory_space<vmem>>, vector<512x128xf32>
      tpu.vector_store %arg7[%c0_11, %c0_12], %12 {strides = array<i32>} : memref<512x128xf32, #tpu.memory_space<vmem>>, vector<512x128xf32>,
    } else {
    }
    %c0 = arith.constant 0 : index
    %c0_1 = arith.constant 0 : index
    %3 = vector.load %arg7[%c0, %c0_1] : memref<512x128xf32, #tpu.memory_space<vmem>>, vector<512x128xf32>
    %c0_2 = arith.constant 0 : index
    %c0_3 = arith.constant 0 : index
    %4 = vector.load %arg2[%c0_2, %c0_3] : memref<512x1792xbf16, #tpu.memory_space<vmem>>, vector<512x1792xbf16>
    %c0_4 = arith.constant 0 : index
    %c0_5 = arith.constant 0 : index
    %5 = vector.load %arg3[%c0_4, %c0_5] : memref<1792x128xbf16, #tpu.memory_space<vmem>>, vector<1792x128xbf16>
    %cst = arith.constant dense<0.000000e+00> : vector<512x128xf32>
    %6 = tpu.matmul %4, %5, %cst {dimension_numbers = #tpu.dot_dimension_numbers<[1], [0], [0], [1], [0, 0, 1, 1], [], []>} : vector<512x1792xbf16>, vector<1792x128xbf16>, vector<512x128xf32> -> vector<512x128xf32>
    %7 = arith.addf %3, %6 : vector<512x128xf32>
    %c0_6 = arith.constant 0 : index
    %c0_7 = arith.constant 0 : index
    %8 = vector.load %arg7[%c0_6, %c0_7] : memref<512x128xf32, #tpu.memory_space<vmem>>, vector<512x128xf32>
    tpu.vector_store %arg7[%c0_6, %c0_7], %7 {strides = array<i32>} : memref<512x128xf32, #tpu.memory_space<vmem>>, vector<512x128xf32>,
    %c0_i32_8 = arith.constant 0 : i32
    %9 = arith.cmpi eq, %arg1, %c0_i32_8 : i32
    %10 = arith.extui %9 : i1 to i32
    %c0_i32_9 = arith.constant 0 : i32
    %11 = arith.cmpi ne, %10, %c0_i32_9 : i32
    scf.if %11 {
      %c0_10 = arith.constant 0 : index
      %c0_11 = arith.constant 0 : index
      %12 = vector.load %arg7[%c0_10, %c0_11] : memref<512x128xf32, #tpu.memory_space<vmem>>, vector<512x128xf32>
      %c0_12 = arith.constant 0 : index
      %c0_13 = arith.constant 0 : index
      %13 = vector.load %arg4[%c0_12, %c0_13] : memref<1x128xf32, #tpu.memory_space<vmem>>, vector<1x128xf32>
      %14 = vector.broadcast %13 : vector<1x128xf32> to vector<512x128xf32>
      %15 = arith.mulf %12, %14 : vector<512x128xf32>
      %c0_14 = arith.constant 0 : index
      %c0_15 = arith.constant 0 : index
      %16 = vector.load %arg5[%c0_14, %c0_15] : memref<1x128xf32, #tpu.memory_space<vmem>>, vector<1x128xf32>
      %17 = vector.broadcast %16 : vector<1x128xf32> to vector<512x128xf32>
      %18 = arith.addf %15, %17 : vector<512x128xf32>
      %cst_16 = arith.constant 0.000000e+00 : f32
      %19 = vector.broadcast %cst_16 : f32 to vector<512x128xf32>
      %20 = arith.maximumf %18, %19 : vector<512x128xf32>
      %21 = arith.truncf %20 : vector<512x128xf32> to vector<512x128xbf16>
      %c0_17 = arith.constant 0 : index
      %c0_18 = arith.constant 0 : index
      %22 = vector.load %arg6[%c0_17, %c0_18] : memref<512x128xbf16, #tpu.memory_space<vmem>>, vector<512x128xbf16>
      tpu.vector_store %arg6[%c0_17, %c0_18], %21 {strides = array<i32>} : memref<512x128xbf16, #tpu.memory_space<vmem>>, vector<512x128xbf16>,
    } else {
    }
    return
  }
  func.func @transform_0(%arg0: i32, %arg1: i32) -> (i32, i32) {
    %c0_i32 = arith.constant 0 : i32
    return %arg0, %arg1 : i32, i32
  }
  func.func @transform_1(%arg0: i32, %arg1: i32) -> (i32, i32) {
    %c0_i32 = arith.constant 0 : i32
    %c0_i32_0 = arith.constant 0 : i32
    return %arg1, %c0_i32 : i32, i32
  }
  func.func @transform_2(%arg0: i32, %arg1: i32) -> (i32, i32) {
    %c0_i32 = arith.constant 0 : i32
    %c0_i32_0 = arith.constant 0 : i32
    %c0_i32_1 = arith.constant 0 : i32
    return %c0_i32, %c0_i32_0 : i32, i32
  }
  func.func @transform_3(%arg0: i32, %arg1: i32) -> (i32, i32) {
    %c0_i32 = arith.constant 0 : i32
    %c0_i32_0 = arith.constant 0 : i32
    %c0_i32_1 = arith.constant 0 : i32
    return %c0_i32, %c0_i32_0 : i32, i32
  }
  func.func @transform_4(%arg0: i32, %arg1: i32) -> (i32, i32) {
    %c0_i32 = arith.constant 0 : i32
    %c0_i32_0 = arith.constant 0 : i32
    return %arg0, %c0_i32 : i32, i32
  }
}

module attributes {stable_mosaic.version = 11 : i64} {
  func.func @kernel(%arg0: i32, %arg1: i32, %arg2: memref<512x1792xf32, #tpu.memory_space<vmem>>, %arg3: memref<1792x128xf32, #tpu.memory_space<vmem>>, %arg4: memref<1x128xf32, #tpu.memory_space<vmem>>, %arg5: memref<512x128xf32, #tpu.memory_space<vmem>>, %arg6: memref<512x128xf32, #tpu.memory_space<vmem>>) attributes {dimension_semantics = [#tpu.dimension_semantics<parallel>, #tpu.dimension_semantics<arbitrary>], iteration_bounds = array<i64: 16, 1>, scalar_prefetch = 0 : i64, scratch_operands = 1 : i64, tpu.core_type = #tpu.core_type<tc>, window_params = [{transform_indices = @transform_0, window_bounds = array<i64: 512, 1792>}, {transform_indices = @transform_1, window_bounds = array<i64: 1792, 128>}, {pipeline_mode = #tpu.pipeline_mode<synchronous>, transform_indices = @transform_2, window_bounds = array<i64: 1, 128>}, {transform_indices = @transform_3, window_bounds = array<i64: 512, 128>}]} {
    %c0_i32 = arith.constant 0 : i32
    %0 = arith.cmpi eq, %arg1, %c0_i32 : i32
    %1 = arith.extui %0 : i1 to i32
    %c0_i32_0 = arith.constant 0 : i32
    %2 = arith.cmpi ne, %1, %c0_i32_0 : i32
    scf.if %2 {
      %cst_10 = arith.constant 0.000000e+00 : f32
      %12 = vector.broadcast %cst_10 : f32 to vector<512x128xf32>
      %c0_11 = arith.constant 0 : index
      %c0_12 = arith.constant 0 : index
      %13 = vector.load %arg6[%c0_11, %c0_12] : memref<512x128xf32, #tpu.memory_space<vmem>>, vector<512x128xf32>
      tpu.vector_store %arg6[%c0_11, %c0_12], %12 {strides = array<i32>} : memref<512x128xf32, #tpu.memory_space<vmem>>, vector<512x128xf32>,
    } else {
    }
    %c0 = arith.constant 0 : index
    %c0_1 = arith.constant 0 : index
    %3 = vector.load %arg6[%c0, %c0_1] : memref<512x128xf32, #tpu.memory_space<vmem>>, vector<512x128xf32>
    %c0_2 = arith.constant 0 : index
    %c0_3 = arith.constant 0 : index
    %4 = vector.load %arg2[%c0_2, %c0_3] : memref<512x1792xf32, #tpu.memory_space<vmem>>, vector<512x1792xf32>
    %c0_4 = arith.constant 0 : index
    %c0_5 = arith.constant 0 : index
    %5 = vector.load %arg3[%c0_4, %c0_5] : memref<1792x128xf32, #tpu.memory_space<vmem>>, vector<1792x128xf32>
    %cst = arith.constant dense<0.000000e+00> : vector<512x128xf32>
    %6 = tpu.matmul %4, %5, %cst {dimension_numbers = #tpu.dot_dimension_numbers<[1], [0], [0], [1], [0, 0, 1, 1], [], []>} : vector<512x1792xf32>, vector<1792x128xf32>, vector<512x128xf32> -> vector<512x128xf32>
    %7 = arith.addf %3, %6 : vector<512x128xf32>
    %c0_6 = arith.constant 0 : index
    %c0_7 = arith.constant 0 : index
    %8 = vector.load %arg6[%c0_6, %c0_7] : memref<512x128xf32, #tpu.memory_space<vmem>>, vector<512x128xf32>
    tpu.vector_store %arg6[%c0_6, %c0_7], %7 {strides = array<i32>} : memref<512x128xf32, #tpu.memory_space<vmem>>, vector<512x128xf32>,
    %c0_i32_8 = arith.constant 0 : i32
    %9 = arith.cmpi eq, %arg1, %c0_i32_8 : i32
    %10 = arith.extui %9 : i1 to i32
    %c0_i32_9 = arith.constant 0 : i32
    %11 = arith.cmpi ne, %10, %c0_i32_9 : i32
    scf.if %11 {
      %c0_10 = arith.constant 0 : index
      %c0_11 = arith.constant 0 : index
      %12 = vector.load %arg6[%c0_10, %c0_11] : memref<512x128xf32, #tpu.memory_space<vmem>>, vector<512x128xf32>
      %c0_12 = arith.constant 0 : index
      %c0_13 = arith.constant 0 : index
      %13 = vector.load %arg4[%c0_12, %c0_13] : memref<1x128xf32, #tpu.memory_space<vmem>>, vector<1x128xf32>
      %14 = vector.broadcast %13 : vector<1x128xf32> to vector<512x128xf32>
      %15 = arith.addf %12, %14 : vector<512x128xf32>
      %c0_14 = arith.constant 0 : index
      %c0_15 = arith.constant 0 : index
      %16 = vector.load %arg5[%c0_14, %c0_15] : memref<512x128xf32, #tpu.memory_space<vmem>>, vector<512x128xf32>
      tpu.vector_store %arg5[%c0_14, %c0_15], %15 {strides = array<i32>} : memref<512x128xf32, #tpu.memory_space<vmem>>, vector<512x128xf32>,
    } else {
    }
    return
  }
  func.func @transform_0(%arg0: i32, %arg1: i32) -> (i32, i32) {
    %c0_i32 = arith.constant 0 : i32
    return %arg0, %arg1 : i32, i32
  }
  func.func @transform_1(%arg0: i32, %arg1: i32) -> (i32, i32) {
    %c0_i32 = arith.constant 0 : i32
    %c0_i32_0 = arith.constant 0 : i32
    return %arg1, %c0_i32 : i32, i32
  }
  func.func @transform_2(%arg0: i32, %arg1: i32) -> (i32, i32) {
    %c0_i32 = arith.constant 0 : i32
    %c0_i32_0 = arith.constant 0 : i32
    %c0_i32_1 = arith.constant 0 : i32
    return %c0_i32, %c0_i32_0 : i32, i32
  }
  func.func @transform_3(%arg0: i32, %arg1: i32) -> (i32, i32) {
    %c0_i32 = arith.constant 0 : i32
    %c0_i32_0 = arith.constant 0 : i32
    return %arg0, %c0_i32 : i32, i32
  }
}

</mosaic_0001>

<bundles_post_ra>
// kernel: tile.28
= control target key start
LH: loop header
LB: loop body
LE: loop exit
PB: predicated region body
PF: predicated region fallthrough
CT: control target
= control target key end

     0   :  { %s22_s0 = inlined_call_operand.vmem [shape: f32[128], index: 0, kind: input, shape index: {}]   ;;  %s23_s1 = inlined_call_operand.vmem [shape: f32[8,128], index: 1, kind: output, shape index: {}]  }
   0x1   :  { %v4_v0 = vld [vmem:[%s22_s0] ss:$0 sm:$0xff] }
   0x2   :  { %5 = vst [vmem:[%s23_s1] sm:$0xff] %v4_v0 }

</bundles_post_ra>
